<compile_context>
chip_gen: v6e
topology: v6e:2x2x1
jax: 0.10.0
libtpu: 0.0.40
codegen_flags: <defaults>
</compile_context>

<pallas_src>
import functools
import math

import jax
import jax.numpy as jnp
from jax.experimental import pallas as pl
from jax.experimental.pallas import tpu as pltpu


def _coafusion_kernel(num_heads, collapse_out,
                      x1_ref, x2_ref,
                      wq_ref, wkv_ref, wo_ref, wf_ref,
                      bq_ref, bkv_ref, bo_ref, bf_ref,
                      out_ref):
    """One grid step == one batch tile of bt batch elements.

    x1_ref : (bt, L1, D) f32   query source
    x2_ref : (bt, L2, D) f32   key/value source
    wq_ref : (D, D)   bf16     pre-transposed q projection
    wkv_ref: (D, 2D)  bf16     pre-transposed [k | v] projection (fused)
    wo_ref : (D, D)   bf16     attention output projection
    wf_ref : (D, D)   bf16     fusion Linear
    b*_ref : (1, D)/(1, 2D) f32 biases
    out_ref: (bt, L1, D) or (bt, L1*D) in out dtype
    """
    bt, L1, D = x1_ref.shape
    _, L2, _ = x2_ref.shape
    H = num_heads
    hd = D // H
    scale = 1.0 / math.sqrt(hd)

    # Cast activations to bf16 once, in-kernel (after the DMA).
    x1 = x1_ref[...].astype(jnp.bfloat16).reshape(bt * L1, D)
    x2 = x2_ref[...].astype(jnp.bfloat16).reshape(bt * L2, D)

    # In-projections: bf16 MXU inputs, f32 accumulation; k|v fused in one matmul.
    q = jnp.dot(x1, wq_ref[...], preferred_element_type=jnp.float32) + bq_ref[...]
    kv = jnp.dot(x2, wkv_ref[...], preferred_element_type=jnp.float32) + bkv_ref[...]

    # Fold 1/sqrt(hd) into q once (O(L1*D), not O(H*L1*L2)).
    q = (q * scale).astype(jnp.bfloat16).reshape(bt, L1, D)
    k = kv[:, :D].astype(jnp.bfloat16).reshape(bt, L2, D)
    v = kv[:, D:].astype(jnp.bfloat16).reshape(bt, L2, D)

    # Collapse (head, batch-tile) into ONE leading batch dim so every head runs
    # inside a single batched einsum (single-batch-dim dot_general).
    qh = jnp.concatenate([q[:, :, h * hd:(h + 1) * hd] for h in range(H)], axis=0)
    kh = jnp.concatenate([k[:, :, h * hd:(h + 1) * hd] for h in range(H)], axis=0)
    vh = jnp.concatenate([v[:, :, h * hd:(h + 1) * hd] for h in range(H)], axis=0)
    # qh/kh/vh: (H*bt, L, hd), head-major on the batch axis.

    s = jnp.einsum("bqe,bke->bqk", qh, kh,
                   preferred_element_type=jnp.float32)           # (H*bt, L1, L2)
    m = jnp.max(s, axis=-1, keepdims=True)
    p = jnp.exp(s - m)
    l = jnp.sum(p, axis=-1, keepdims=True)                       # (H*bt, L1, 1)
    # TODO(synk): attention dropout (p=0.25) skipped — eval-mode identity.
    o = jnp.einsum("bqk,bke->bqe", p.astype(jnp.bfloat16), vh,
                   preferred_element_type=jnp.float32)           # (H*bt, L1, hd)
    # Softmax denominator applied on the small result; approx recip -> EUP slot.
    o = o * pl.reciprocal(l, approx=True)

    # Re-assemble heads along the feature axis (PyTorch concat order), then a
    # SINGLE full-K (bt*L1, D) @ (D, D) output projection.
    o = jnp.concatenate([o[h * bt:(h + 1) * bt] for h in range(H)], axis=-1)
    o = o.reshape(bt * L1, D).astype(jnp.bfloat16)
    attn_out = jnp.dot(o, wo_ref[...], preferred_element_type=jnp.float32) + bo_ref[...]

    # Fusion layer: Linear -> ReLU.
    # TODO(synk): fusion dropout (p=0.1) skipped — eval-mode identity.
    fused = jnp.dot(attn_out.astype(jnp.bfloat16), wf_ref[...],
                    preferred_element_type=jnp.float32) + bf_ref[...]
    fused = jnp.maximum(fused, 0.0)

    if collapse_out:
        out_ref[...] = fused.reshape(bt, L1 * D).astype(out_ref.dtype)
    else:
        out_ref[...] = fused.reshape(bt, L1, D).astype(out_ref.dtype)


def _choose_batch_tile(B, L1, L2, D, num_heads):
    # Target M = bt*L1 ≈ 256 rows (v6e/v7x MXU row tile; also a multiple of 128
    # for v5e); keep >= 2 grid steps when B allows (v7x has 2 TensorCores) so
    # the "parallel" batch axis can be sharded; cap by a conservative per-tile
    # f32-intermediate budget so tiles also fit v7x's 64 MiB VMEM.
    bt = max(1, min(B, 256 // max(L1, 1)))
    if B >= 2:
        bt = min(bt, pl.cdiv(B, 2))
    per_batch_f32 = (num_heads * L1 * L2 + 4 * (L1 + L2) * D) * 4
    budget = 24 * 1024 * 1024
    bt = max(1, min(bt, budget // max(per_batch_f32, 1)))
    return bt


def _vmem_limit_bytes(bt, L1, L2, D, num_heads, out_bytes_per_elt):
    in_blocks = 2 * bt * (L1 + L2) * D * 4              # double-buffered f32 inputs
    out_blocks = 2 * bt * L1 * D * out_bytes_per_elt    # double-buffered output
    weights = 5 * D * D * 2 + 8 * D * 4                 # bf16 weights + f32 biases
    live = bt * (num_heads * L1 * L2 + 4 * (L1 + L2) * D) * 4
    est = in_blocks + out_blocks + weights + live
    return int(min(max(2 * est, 32 * 1024 * 1024), 64 * 1024 * 1024))


def prepare_kernel_params(params):
    """One-time weight prep (fuse k|v, cast weights to bf16). Do NOT call per step."""
    return {
        "wq": params["wq"].astype(jnp.bfloat16),
        "wkv": jnp.concatenate([params["wk"], params["wv"]], axis=1).astype(jnp.bfloat16),
        "wo": params["wo"].astype(jnp.bfloat16),
        "wf": params["wf"].astype(jnp.bfloat16),
        "bq": params["bq"].astype(jnp.float32),
        "bkv": jnp.concatenate([params["bk"], params["bv"]], axis=1).astype(jnp.float32),
        "bo": params["bo"].astype(jnp.float32),
        "bf": params["bf"].astype(jnp.float32),
    }


def coafusion_forward(x1, x2, kparams, num_heads, out_dtype=jnp.bfloat16):
    B, L1, D = x1.shape
    B2, L2, D2 = x2.shape
    assert B2 == B and D2 == D
    assert D % num_heads == 0, "embed dim must be divisible by num_heads"

    bt = _choose_batch_tile(B, L1, L2, D, num_heads)
    grid = pl.cdiv(B, bt)
    B_pad = grid * bt
    if B_pad != B:  # cdiv tiling: zero-pad the batch tail, slice after the call
        x1 = jnp.concatenate([x1, jnp.zeros((B_pad - B, L1, D), x1.dtype)], axis=0)
        x2 = jnp.concatenate([x2, jnp.zeros((B_pad - B, L2, D), x2.dtype)], axis=0)

    # Lane-dense output: if D is not a lane multiple but L1*D is, collapse the
    # output block to (bt, L1*D) so stores are full-lane, when the block is legal.
    collapse_out = (D % 128 != 0) and ((L1 * D) % 128 == 0) and (bt % 8 == 0 or bt == B_pad)

    weight_args = [kparams["wq"], kparams["wkv"], kparams["wo"], kparams["wf"],
                   kparams["bq"], kparams["bkv"], kparams["bo"], kparams["bf"]]

    out_itemsize = jnp.dtype(out_dtype).itemsize
    flops = 2 * B_pad * (3 * L1 * D * D + 2 * L2 * D * D + 2 * L1 * L2 * D)
    transcendentals = B_pad * num_heads * L1 * L2
    bytes_accessed = (B_pad * (L1 + L2) * D * 4 + 5 * D * D * 2 + 8 * D * 4
                      + B_pad * L1 * D * out_itemsize)
    cost = pl.CostEstimate(flops=int(flops), transcendentals=int(transcendentals),
                           bytes_accessed=int(bytes_accessed))

    if collapse_out:
        out_shape = jax.ShapeDtypeStruct((B_pad, L1 * D), out_dtype)
        out_spec = pl.BlockSpec((bt, L1 * D), lambda b: (b, 0))
    else:
        out_shape = jax.ShapeDtypeStruct((B_pad, L1, D), out_dtype)
        out_spec = pl.BlockSpec((bt, L1, D), lambda b: (b, 0, 0))

    kernel = functools.partial(_coafusion_kernel, num_heads, collapse_out)
    vmem_limit = _vmem_limit_bytes(bt, L1, L2, D, num_heads, out_itemsize)

    def build(single_buffer_weights):
        in_specs = [
            pl.BlockSpec((bt, L1, D), lambda b: (b, 0, 0)),
            pl.BlockSpec((bt, L2, D), lambda b: (b, 0, 0)),
        ]
        for w in weight_args:
            kw = {}
            if single_buffer_weights:
                # Constant index map -> no need to double-buffer the weights.
                kw["pipeline_mode"] = pl.Buffered(1)
            in_specs.append(pl.BlockSpec(w.shape, lambda b, nd=w.ndim: (0,) * nd, **kw))
        return pl.pallas_call(
            kernel,
            out_shape=out_shape,
            grid_spec=pltpu.PrefetchScalarGridSpec(
                num_scalar_prefetch=0,
                grid=(grid,),
                in_specs=in_specs,
                out_specs=out_spec,
            ),
            compiler_params=pltpu.CompilerParams(
                dimension_semantics=("parallel",),
                vmem_limit_bytes=vmem_limit,
            ),
            cost_estimate=cost,
        )

    try:
        out = jax.block_until_ready(build(True)(x1, x2, *weight_args))
    except Exception:
        # If this JAX build rejects single-buffered weight specs, fall back to
        # default (double-buffered) BlockSpecs.
        out = build(False)(x1, x2, *weight_args)

    if collapse_out:
        out = out.reshape(B_pad, L1, D)
    return out[:B]


def coafusion_reference(x1, x2, params, num_heads):
    """Pure-JAX f32 reference mirroring the PyTorch forward (eval mode)."""
    B, L1, D = x1.shape
    hd = D // num_heads
    scale = 1.0 / math.sqrt(hd)

    q = x1 @ params["wq"] + params["bq"]
    k = x2 @ params["wk"] + params["bk"]
    v = x2 @ params["wv"] + params["bv"]

    def split(t):
        Bt, Lt, _ = t.shape
        return t.reshape(Bt, Lt, num_heads, hd).transpose(0, 2, 1, 3)

    qh, kh, vh = split(q), split(k), split(v)          # (B, H, L, hd)
    s = jnp.einsum("bhqd,bhkd->bhqk", qh, kh) * scale
    p = jax.nn.softmax(s, axis=-1)
    o = jnp.einsum("bhqk,bhkd->bhqd", p, vh)           # (B, H, L1, hd)
    o = o.transpose(0, 2, 1, 3).reshape(B, L1, D)

    attn_out = o @ params["wo"] + params["bo"]
    fused = jax.nn.relu(attn_out @ params["wf"] + params["bf"])
    return fused


def init_params(key, dim):
    ks = jax.random.split(key, 6)
    scale = 0.05
    return {
        "wq": scale * jax.random.normal(ks[0], (dim, dim), jnp.float32),
        "wk": scale * jax.random.normal(ks[1], (dim, dim), jnp.float32),
        "wv": scale * jax.random.normal(ks[2], (dim, dim), jnp.float32),
        "bq": jnp.zeros((1, dim), jnp.float32),
        "bk": jnp.zeros((1, dim), jnp.float32),
        "bv": jnp.zeros((1, dim), jnp.float32),
        "wo": scale * jax.random.normal(ks[3], (dim, dim), jnp.float32),
        "bo": 0.01 * jnp.ones((1, dim), jnp.float32),
        "wf": scale * jax.random.normal(ks[4], (dim, dim), jnp.float32),
        "bf": 0.01 * jnp.ones((1, dim), jnp.float32),
    }


if __name__ == "__main__":
    B, L, D, H = 2, 8, 32, 4          # batch, seq, embed dim, num heads

    key = jax.random.PRNGKey(0)
    k1, k2, kp = jax.random.split(key, 3)
    x1 = jax.random.normal(k1, (B, L, D), jnp.float32)
    x2 = jax.random.normal(k2, (B, L, D), jnp.float32)
    params = init_params(kp, D)
    kparams = prepare_kernel_params(params)   # one-time fused/bf16 weight prep

    out = coafusion_forward(x1, x2, kparams, num_heads=H)
    out = jax.block_until_ready(out)

    ref = coafusion_reference(x1, x2, params, num_heads=H)
    assert out.shape == (B, L, D)
    # Kernel uses bf16 MXU inputs / bf16 output (f32 accumulation); compare
    # with a tolerance sized for bf16 rounding at these magnitudes.
    err = float(jnp.max(jnp.abs(out.astype(jnp.float32) - ref)))
    assert err < 3e-2, err

    print("KERNEL_OK")
</pallas_src>

<mosaic_0001>
module attributes {stable_mosaic.version = 11 : i64} {
  func.func @_coafusion_kernel(%arg0: i32, %arg1: memref<1x8x32xf32, #tpu.memory_space<vmem>>, %arg2: memref<1x8x32xf32, #tpu.memory_space<vmem>>, %arg3: memref<32x32xbf16, #tpu.memory_space<vmem>>, %arg4: memref<32x64xbf16, #tpu.memory_space<vmem>>, %arg5: memref<32x32xbf16, #tpu.memory_space<vmem>>, %arg6: memref<32x32xbf16, #tpu.memory_space<vmem>>, %arg7: memref<1x32xf32, #tpu.memory_space<vmem>>, %arg8: memref<1x64xf32, #tpu.memory_space<vmem>>, %arg9: memref<1x32xf32, #tpu.memory_space<vmem>>, %arg10: memref<1x32xf32, #tpu.memory_space<vmem>>, %arg11: memref<1x8x32xbf16, #tpu.memory_space<vmem>>) attributes {dimension_semantics = [#tpu.dimension_semantics<parallel>], iteration_bounds = array<i64: 2>, scalar_prefetch = 0 : i64, scratch_operands = 0 : i64, tpu.core_type = #tpu.core_type<tc>, window_params = [{transform_indices = @transform_0, window_bounds = array<i64: 1, 8, 32>}, {transform_indices = @transform_1, window_bounds = array<i64: 1, 8, 32>}, {pipeline_mode = #tpu.pipeline_mode<synchronous>, transform_indices = @transform_2, window_bounds = array<i64: 32, 32>}, {pipeline_mode = #tpu.pipeline_mode<synchronous>, transform_indices = @transform_3, window_bounds = array<i64: 32, 64>}, {pipeline_mode = #tpu.pipeline_mode<synchronous>, transform_indices = @transform_4, window_bounds = array<i64: 32, 32>}, {pipeline_mode = #tpu.pipeline_mode<synchronous>, transform_indices = @transform_5, window_bounds = array<i64: 32, 32>}, {pipeline_mode = #tpu.pipeline_mode<synchronous>, transform_indices = @transform_6, window_bounds = array<i64: 1, 32>}, {pipeline_mode = #tpu.pipeline_mode<synchronous>, transform_indices = @transform_7, window_bounds = array<i64: 1, 64>}, {pipeline_mode = #tpu.pipeline_mode<synchronous>, transform_indices = @transform_8, window_bounds = array<i64: 1, 32>}, {pipeline_mode = #tpu.pipeline_mode<synchronous>, transform_indices = @transform_9, window_bounds = array<i64: 1, 32>}, {transform_indices = @transform_10, window_bounds = array<i64: 1, 8, 32>}]} {
    %c0 = arith.constant 0 : index
    %c0_0 = arith.constant 0 : index
    %c0_1 = arith.constant 0 : index
    %0 = vector.load %arg1[%c0, %c0_0, %c0_1] : memref<1x8x32xf32, #tpu.memory_space<vmem>>, vector<1x8x32xf32>
    %1 = arith.truncf %0 : vector<1x8x32xf32> to vector<1x8x32xbf16>
    %2 = vector.shape_cast %1 : vector<1x8x32xbf16> to vector<8x32xbf16>
    %c0_2 = arith.constant 0 : index
    %c0_3 = arith.constant 0 : index
    %c0_4 = arith.constant 0 : index
    %3 = vector.load %arg2[%c0_2, %c0_3, %c0_4] : memref<1x8x32xf32, #tpu.memory_space<vmem>>, vector<1x8x32xf32>
    %4 = arith.truncf %3 : vector<1x8x32xf32> to vector<1x8x32xbf16>
    %5 = vector.shape_cast %4 : vector<1x8x32xbf16> to vector<8x32xbf16>
    %c0_5 = arith.constant 0 : index
    %c0_6 = arith.constant 0 : index
    %6 = vector.load %arg3[%c0_5, %c0_6] : memref<32x32xbf16, #tpu.memory_space<vmem>>, vector<32x32xbf16>
    %cst = arith.constant dense<0.000000e+00> : vector<8x32xf32>
    %7 = tpu.matmul %2, %6, %cst {dimension_numbers = #tpu.dot_dimension_numbers<[1], [0], [0], [1], [0, 0, 1, 1], [], []>} : vector<8x32xbf16>, vector<32x32xbf16>, vector<8x32xf32> -> vector<8x32xf32>
    %c0_7 = arith.constant 0 : index
    %c0_8 = arith.constant 0 : index
    %8 = vector.load %arg7[%c0_7, %c0_8] : memref<1x32xf32, #tpu.memory_space<vmem>>, vector<1x32xf32>
    %9 = vector.broadcast %8 : vector<1x32xf32> to vector<8x32xf32>
    %10 = arith.addf %7, %9 : vector<8x32xf32>
    %c0_9 = arith.constant 0 : index
    %c0_10 = arith.constant 0 : index
    %11 = vector.load %arg4[%c0_9, %c0_10] : memref<32x64xbf16, #tpu.memory_space<vmem>>, vector<32x64xbf16>
    %cst_11 = arith.constant dense<0.000000e+00> : vector<8x64xf32>
    %12 = tpu.matmul %5, %11, %cst_11 {dimension_numbers = #tpu.dot_dimension_numbers<[1], [0], [0], [1], [0, 0, 1, 1], [], []>} : vector<8x32xbf16>, vector<32x64xbf16>, vector<8x64xf32> -> vector<8x64xf32>
    %c0_12 = arith.constant 0 : index
    %c0_13 = arith.constant 0 : index
    %13 = vector.load %arg8[%c0_12, %c0_13] : memref<1x64xf32, #tpu.memory_space<vmem>>, vector<1x64xf32>
    %14 = vector.broadcast %13 : vector<1x64xf32> to vector<8x64xf32>
    %15 = arith.addf %12, %14 : vector<8x64xf32>
    %cst_14 = arith.constant 0.353553385 : f32
    %16 = vector.broadcast %cst_14 : f32 to vector<8x32xf32>
    %17 = arith.mulf %10, %16 : vector<8x32xf32>
    %18 = arith.truncf %17 : vector<8x32xf32> to vector<8x32xbf16>
    %19 = vector.shape_cast %18 : vector<8x32xbf16> to vector<1x8x32xbf16>
    %20 = vector.extract_strided_slice %15 {offsets = [0, 0], sizes = [8, 32], strides = [1, 1]} : vector<8x64xf32> to vector<8x32xf32>
    %21 = arith.truncf %20 : vector<8x32xf32> to vector<8x32xbf16>
    %22 = vector.shape_cast %21 : vector<8x32xbf16> to vector<1x8x32xbf16>
    %23 = vector.extract_strided_slice %15 {offsets = [0, 32], sizes = [8, 32], strides = [1, 1]} : vector<8x64xf32> to vector<8x32xf32>
    %24 = arith.truncf %23 : vector<8x32xf32> to vector<8x32xbf16>
    %25 = vector.shape_cast %24 : vector<8x32xbf16> to vector<1x8x32xbf16>
    %26 = vector.extract_strided_slice %19 {offsets = [0, 0, 0], sizes = [1, 8, 8], strides = [1, 1, 1]} : vector<1x8x32xbf16> to vector<1x8x8xbf16>
    %27 = vector.extract_strided_slice %19 {offsets = [0, 0, 8], sizes = [1, 8, 8], strides = [1, 1, 1]} : vector<1x8x32xbf16> to vector<1x8x8xbf16>
    %28 = vector.extract_strided_slice %19 {offsets = [0, 0, 16], sizes = [1, 8, 8], strides = [1, 1, 1]} : vector<1x8x32xbf16> to vector<1x8x8xbf16>
    %29 = vector.extract_strided_slice %19 {offsets = [0, 0, 24], sizes = [1, 8, 8], strides = [1, 1, 1]} : vector<1x8x32xbf16> to vector<1x8x8xbf16>
    %30 = tpu.concatenate %26, %27, %28, %29 in 0 : vector<1x8x8xbf16>, vector<1x8x8xbf16>, vector<1x8x8xbf16>, vector<1x8x8xbf16> -> vector<4x8x8xbf16>
    %31 = vector.extract_strided_slice %22 {offsets = [0, 0, 0], sizes = [1, 8, 8], strides = [1, 1, 1]} : vector<1x8x32xbf16> to vector<1x8x8xbf16>
    %32 = vector.extract_strided_slice %22 {offsets = [0, 0, 8], sizes = [1, 8, 8], strides = [1, 1, 1]} : vector<1x8x32xbf16> to vector<1x8x8xbf16>
    %33 = vector.extract_strided_slice %22 {offsets = [0, 0, 16], sizes = [1, 8, 8], strides = [1, 1, 1]} : vector<1x8x32xbf16> to vector<1x8x8xbf16>
    %34 = vector.extract_strided_slice %22 {offsets = [0, 0, 24], sizes = [1, 8, 8], strides = [1, 1, 1]} : vector<1x8x32xbf16> to vector<1x8x8xbf16>
    %35 = tpu.concatenate %31, %32, %33, %34 in 0 : vector<1x8x8xbf16>, vector<1x8x8xbf16>, vector<1x8x8xbf16>, vector<1x8x8xbf16> -> vector<4x8x8xbf16>
    %36 = vector.extract_strided_slice %25 {offsets = [0, 0, 0], sizes = [1, 8, 8], strides = [1, 1, 1]} : vector<1x8x32xbf16> to vector<1x8x8xbf16>
    %37 = vector.extract_strided_slice %25 {offsets = [0, 0, 8], sizes = [1, 8, 8], strides = [1, 1, 1]} : vector<1x8x32xbf16> to vector<1x8x8xbf16>
    %38 = vector.extract_strided_slice %25 {offsets = [0, 0, 16], sizes = [1, 8, 8], strides = [1, 1, 1]} : vector<1x8x32xbf16> to vector<1x8x8xbf16>
    %39 = vector.extract_strided_slice %25 {offsets = [0, 0, 24], sizes = [1, 8, 8], strides = [1, 1, 1]} : vector<1x8x32xbf16> to vector<1x8x8xbf16>
    %40 = tpu.concatenate %36, %37, %38, %39 in 0 : vector<1x8x8xbf16>, vector<1x8x8xbf16>, vector<1x8x8xbf16>, vector<1x8x8xbf16> -> vector<4x8x8xbf16>
    "tpu.trace_start"() <{level = 10 : i32, message = "bqe,bke->bqk"}> : () -> ()
    %cst_15 = arith.constant dense<0.000000e+00> : vector<4x8x8xf32>
    %41 = tpu.matmul %30, %35, %cst_15 {dimension_numbers = #tpu.dot_dimension_numbers<[2], [2], [1], [1], [0, 0, 0, 1, 1, 1], [0], [0]>} : vector<4x8x8xbf16>, vector<4x8x8xbf16>, vector<4x8x8xf32> -> vector<4x8x8xf32>
    "tpu.trace_stop"() : () -> ()
    %cst_16 = arith.constant dense<0xFF800000> : vector<4x8xf32>
    %42 = vector.multi_reduction <maximumf>, %41, %cst_16 [2] : vector<4x8x8xf32> to vector<4x8xf32>
    %43 = vector.shape_cast %42 : vector<4x8xf32> to vector<4x8x1xf32>
    %44 = vector.broadcast %43 : vector<4x8x1xf32> to vector<4x8x8xf32>
    %45 = arith.subf %41, %44 : vector<4x8x8xf32>
    %46 = math.exp %45 : vector<4x8x8xf32>
    %cst_17 = arith.constant dense<0.000000e+00> : vector<4x8xf32>
    %47 = vector.multi_reduction <add>, %46, %cst_17 [2] : vector<4x8x8xf32> to vector<4x8xf32>
    %48 = vector.shape_cast %47 : vector<4x8xf32> to vector<4x8x1xf32>
    %49 = arith.truncf %46 : vector<4x8x8xf32> to vector<4x8x8xbf16>
    "tpu.trace_start"() <{level = 10 : i32, message = "bqk,bke->bqe"}> : () -> ()
    %cst_18 = arith.constant dense<0.000000e+00> : vector<4x8x8xf32>
    %50 = tpu.matmul %49, %40, %cst_18 {dimension_numbers = #tpu.dot_dimension_numbers<[2], [1], [1], [2], [0, 0, 0, 1, 1, 2], [0], [0]>} : vector<4x8x8xbf16>, vector<4x8x8xbf16>, vector<4x8x8xf32> -> vector<4x8x8xf32>
    "tpu.trace_stop"() : () -> ()
    %51 = tpu.reciprocal %48 {approx = true} : vector<4x8x1xf32> -> vector<4x8x1xf32>
    %52 = vector.broadcast %51 : vector<4x8x1xf32> to vector<4x8x8xf32>
    %53 = arith.mulf %50, %52 : vector<4x8x8xf32>
    %54 = vector.extract_strided_slice %53 {offsets = [0, 0, 0], sizes = [1, 8, 8], strides = [1, 1, 1]} : vector<4x8x8xf32> to vector<1x8x8xf32>
    %55 = vector.extract_strided_slice %53 {offsets = [1, 0, 0], sizes = [1, 8, 8], strides = [1, 1, 1]} : vector<4x8x8xf32> to vector<1x8x8xf32>
    %56 = vector.extract_strided_slice %53 {offsets = [2, 0, 0], sizes = [1, 8, 8], strides = [1, 1, 1]} : vector<4x8x8xf32> to vector<1x8x8xf32>
    %57 = vector.extract_strided_slice %53 {offsets = [3, 0, 0], sizes = [1, 8, 8], strides = [1, 1, 1]} : vector<4x8x8xf32> to vector<1x8x8xf32>
    %58 = tpu.concatenate %54, %55, %56, %57 in 2 : vector<1x8x8xf32>, vector<1x8x8xf32>, vector<1x8x8xf32>, vector<1x8x8xf32> -> vector<1x8x32xf32>
    %59 = vector.shape_cast %58 : vector<1x8x32xf32> to vector<8x32xf32>
    %60 = arith.truncf %59 : vector<8x32xf32> to vector<8x32xbf16>
    %c0_19 = arith.constant 0 : index
    %c0_20 = arith.constant 0 : index
    %61 = vector.load %arg5[%c0_19, %c0_20] : memref<32x32xbf16, #tpu.memory_space<vmem>>, vector<32x32xbf16>
    %cst_21 = arith.constant dense<0.000000e+00> : vector<8x32xf32>
    %62 = tpu.matmul %60, %61, %cst_21 {dimension_numbers = #tpu.dot_dimension_numbers<[1], [0], [0], [1], [0, 0, 1, 1], [], []>} : vector<8x32xbf16>, vector<32x32xbf16>, vector<8x32xf32> -> vector<8x32xf32>
    %c0_22 = arith.constant 0 : index
    %c0_23 = arith.constant 0 : index
    %63 = vector.load %arg9[%c0_22, %c0_23] : memref<1x32xf32, #tpu.memory_space<vmem>>, vector<1x32xf32>
    %64 = vector.broadcast %63 : vector<1x32xf32> to vector<8x32xf32>
    %65 = arith.addf %62, %64 : vector<8x32xf32>
    %66 = arith.truncf %65 : vector<8x32xf32> to vector<8x32xbf16>
    %c0_24 = arith.constant 0 : index
    %c0_25 = arith.constant 0 : index
    %67 = vector.load %arg6[%c0_24, %c0_25] : memref<32x32xbf16, #tpu.memory_space<vmem>>, vector<32x32xbf16>
    %cst_26 = arith.constant dense<0.000000e+00> : vector<8x32xf32>
    %68 = tpu.matmul %66, %67, %cst_26 {dimension_numbers = #tpu.dot_dimension_numbers<[1], [0], [0], [1], [0, 0, 1, 1], [], []>} : vector<8x32xbf16>, vector<32x32xbf16>, vector<8x32xf32> -> vector<8x32xf32>
    %c0_27 = arith.constant 0 : index
    %c0_28 = arith.constant 0 : index
    %69 = vector.load %arg10[%c0_27, %c0_28] : memref<1x32xf32, #tpu.memory_space<vmem>>, vector<1x32xf32>
    %70 = vector.broadcast %69 : vector<1x32xf32> to vector<8x32xf32>
    %71 = arith.addf %68, %70 : vector<8x32xf32>
    %cst_29 = arith.constant 0.000000e+00 : f32
    %72 = vector.broadcast %cst_29 : f32 to vector<8x32xf32>
    %73 = arith.maximumf %71, %72 : vector<8x32xf32>
    %74 = vector.shape_cast %73 : vector<8x32xf32> to vector<1x8x32xf32>
    %75 = arith.truncf %74 : vector<1x8x32xf32> to vector<1x8x32xbf16>
    %c0_30 = arith.constant 0 : index
    %c0_31 = arith.constant 0 : index
    %c0_32 = arith.constant 0 : index
    %76 = vector.load %arg11[%c0_30, %c0_31, %c0_32] : memref<1x8x32xbf16, #tpu.memory_space<vmem>>, vector<1x8x32xbf16>
    tpu.vector_store %arg11[%c0_30, %c0_31, %c0_32], %75 {strides = array<i32>} : memref<1x8x32xbf16, #tpu.memory_space<vmem>>, vector<1x8x32xbf16>,
    return
  }
  func.func @transform_0(%arg0: i32) -> (i32, i32, i32) {
    %c0_i32 = arith.constant 0 : i32
    %c0_i32_0 = arith.constant 0 : i32
    %c0_i32_1 = arith.constant 0 : i32
    return %arg0, %c0_i32, %c0_i32_0 : i32, i32, i32
  }
  func.func @transform_1(%arg0: i32) -> (i32, i32, i32) {
    %c0_i32 = arith.constant 0 : i32
    %c0_i32_0 = arith.constant 0 : i32
    %c0_i32_1 = arith.constant 0 : i32
    return %arg0, %c0_i32, %c0_i32_0 : i32, i32, i32
  }
  func.func @transform_2(%arg0: i32) -> (i32, i32) {
    %c0_i32 = arith.constant 0 : i32
    %c0_i32_0 = arith.constant 0 : i32
    %c0_i32_1 = arith.constant 0 : i32
    return %c0_i32, %c0_i32_0 : i32, i32
  }
  func.func @transform_3(%arg0: i32) -> (i32, i32) {
    %c0_i32 = arith.constant 0 : i32
    %c0_i32_0 = arith.constant 0 : i32
    %c0_i32_1 = arith.constant 0 : i32
    return %c0_i32, %c0_i32_0 : i32, i32
  }
  func.func @transform_4(%arg0: i32) -> (i32, i32) {
    %c0_i32 = arith.constant 0 : i32
    %c0_i32_0 = arith.constant 0 : i32
    %c0_i32_1 = arith.constant 0 : i32
    return %c0_i32, %c0_i32_0 : i32, i32
  }
  func.func @transform_5(%arg0: i32) -> (i32, i32) {
    %c0_i32 = arith.constant 0 : i32
    %c0_i32_0 = arith.constant 0 : i32
    %c0_i32_1 = arith.constant 0 : i32
    return %c0_i32, %c0_i32_0 : i32, i32
  }
  func.func @transform_6(%arg0: i32) -> (i32, i32) {
    %c0_i32 = arith.constant 0 : i32
    %c0_i32_0 = arith.constant 0 : i32
    %c0_i32_1 = arith.constant 0 : i32
    return %c0_i32, %c0_i32_0 : i32, i32
  }
  func.func @transform_7(%arg0: i32) -> (i32, i32) {
    %c0_i32 = arith.constant 0 : i32
    %c0_i32_0 = arith.constant 0 : i32
    %c0_i32_1 = arith.constant 0 : i32
    return %c0_i32, %c0_i32_0 : i32, i32
  }
  func.func @transform_8(%arg0: i32) -> (i32, i32) {
    %c0_i32 = arith.constant 0 : i32
    %c0_i32_0 = arith.constant 0 : i32
    %c0_i32_1 = arith.constant 0 : i32
    return %c0_i32, %c0_i32_0 : i32, i32
  }
  func.func @transform_9(%arg0: i32) -> (i32, i32) {
    %c0_i32 = arith.constant 0 : i32
    %c0_i32_0 = arith.constant 0 : i32
    %c0_i32_1 = arith.constant 0 : i32
    return %c0_i32, %c0_i32_0 : i32, i32
  }
  func.func @transform_10(%arg0: i32) -> (i32, i32, i32) {
    %c0_i32 = arith.constant 0 : i32
    %c0_i32_0 = arith.constant 0 : i32
    %c0_i32_1 = arith.constant 0 : i32
    return %arg0, %c0_i32, %c0_i32_0 : i32, i32, i32
  }
}

module attributes {stable_mosaic.version = 11 : i64} {
  func.func @_coafusion_kernel(%arg0: i32, %arg1: memref<1x8x32xf32, #tpu.memory_space<vmem>>, %arg2: memref<1x8x32xf32, #tpu.memory_space<vmem>>, %arg3: memref<32x32xbf16, #tpu.memory_space<vmem>>, %arg4: memref<32x64xbf16, #tpu.memory_space<vmem>>, %arg5: memref<32x32xbf16, #tpu.memory_space<vmem>>, %arg6: memref<32x32xbf16, #tpu.memory_space<vmem>>, %arg7: memref<1x32xf32, #tpu.memory_space<vmem>>, %arg8: memref<1x64xf32, #tpu.memory_space<vmem>>, %arg9: memref<1x32xf32, #tpu.memory_space<vmem>>, %arg10: memref<1x32xf32, #tpu.memory_space<vmem>>, %arg11: memref<1x8x32xbf16, #tpu.memory_space<vmem>>) attributes {dimension_semantics = [#tpu.dimension_semantics<parallel>], iteration_bounds = array<i64: 2>, scalar_prefetch = 0 : i64, scratch_operands = 0 : i64, tpu.core_type = #tpu.core_type<tc>, window_params = [{transform_indices = @transform_0, window_bounds = array<i64: 1, 8, 32>}, {transform_indices = @transform_1, window_bounds = array<i64: 1, 8, 32>}, {pipeline_mode = #tpu.pipeline_mode<synchronous>, transform_indices = @transform_2, window_bounds = array<i64: 32, 32>}, {pipeline_mode = #tpu.pipeline_mode<synchronous>, transform_indices = @transform_3, window_bounds = array<i64: 32, 64>}, {pipeline_mode = #tpu.pipeline_mode<synchronous>, transform_indices = @transform_4, window_bounds = array<i64: 32, 32>}, {pipeline_mode = #tpu.pipeline_mode<synchronous>, transform_indices = @transform_5, window_bounds = array<i64: 32, 32>}, {pipeline_mode = #tpu.pipeline_mode<synchronous>, transform_indices = @transform_6, window_bounds = array<i64: 1, 32>}, {pipeline_mode = #tpu.pipeline_mode<synchronous>, transform_indices = @transform_7, window_bounds = array<i64: 1, 64>}, {pipeline_mode = #tpu.pipeline_mode<synchronous>, transform_indices = @transform_8, window_bounds = array<i64: 1, 32>}, {pipeline_mode = #tpu.pipeline_mode<synchronous>, transform_indices = @transform_9, window_bounds = array<i64: 1, 32>}, {transform_indices = @transform_10, window_bounds = array<i64: 1, 8, 32>}]} {
    %c0 = arith.constant 0 : index
    %c0_0 = arith.constant 0 : index
    %c0_1 = arith.constant 0 : index
    %0 = vector.load %arg1[%c0, %c0_0, %c0_1] : memref<1x8x32xf32, #tpu.memory_space<vmem>>, vector<1x8x32xf32>
    %1 = arith.truncf %0 : vector<1x8x32xf32> to vector<1x8x32xbf16>
    %2 = vector.shape_cast %1 : vector<1x8x32xbf16> to vector<8x32xbf16>
    %c0_2 = arith.constant 0 : index
    %c0_3 = arith.constant 0 : index
    %c0_4 = arith.constant 0 : index
    %3 = vector.load %arg2[%c0_2, %c0_3, %c0_4] : memref<1x8x32xf32, #tpu.memory_space<vmem>>, vector<1x8x32xf32>
    %4 = arith.truncf %3 : vector<1x8x32xf32> to vector<1x8x32xbf16>
    %5 = vector.shape_cast %4 : vector<1x8x32xbf16> to vector<8x32xbf16>
    %c0_5 = arith.constant 0 : index
    %c0_6 = arith.constant 0 : index
    %6 = vector.load %arg3[%c0_5, %c0_6] : memref<32x32xbf16, #tpu.memory_space<vmem>>, vector<32x32xbf16>
    %cst = arith.constant dense<0.000000e+00> : vector<8x32xf32>
    %7 = tpu.matmul %2, %6, %cst {dimension_numbers = #tpu.dot_dimension_numbers<[1], [0], [0], [1], [0, 0, 1, 1], [], []>} : vector<8x32xbf16>, vector<32x32xbf16>, vector<8x32xf32> -> vector<8x32xf32>
    %c0_7 = arith.constant 0 : index
    %c0_8 = arith.constant 0 : index
    %8 = vector.load %arg7[%c0_7, %c0_8] : memref<1x32xf32, #tpu.memory_space<vmem>>, vector<1x32xf32>
    %9 = vector.broadcast %8 : vector<1x32xf32> to vector<8x32xf32>
    %10 = arith.addf %7, %9 : vector<8x32xf32>
    %c0_9 = arith.constant 0 : index
    %c0_10 = arith.constant 0 : index
    %11 = vector.load %arg4[%c0_9, %c0_10] : memref<32x64xbf16, #tpu.memory_space<vmem>>, vector<32x64xbf16>
    %cst_11 = arith.constant dense<0.000000e+00> : vector<8x64xf32>
    %12 = tpu.matmul %5, %11, %cst_11 {dimension_numbers = #tpu.dot_dimension_numbers<[1], [0], [0], [1], [0, 0, 1, 1], [], []>} : vector<8x32xbf16>, vector<32x64xbf16>, vector<8x64xf32> -> vector<8x64xf32>
    %c0_12 = arith.constant 0 : index
    %c0_13 = arith.constant 0 : index
    %13 = vector.load %arg8[%c0_12, %c0_13] : memref<1x64xf32, #tpu.memory_space<vmem>>, vector<1x64xf32>
    %14 = vector.broadcast %13 : vector<1x64xf32> to vector<8x64xf32>
    %15 = arith.addf %12, %14 : vector<8x64xf32>
    %cst_14 = arith.constant 0.353553385 : f32
    %16 = vector.broadcast %cst_14 : f32 to vector<8x32xf32>
    %17 = arith.mulf %10, %16 : vector<8x32xf32>
    %18 = arith.truncf %17 : vector<8x32xf32> to vector<8x32xbf16>
    %19 = vector.shape_cast %18 : vector<8x32xbf16> to vector<1x8x32xbf16>
    %20 = vector.extract_strided_slice %15 {offsets = [0, 0], sizes = [8, 32], strides = [1, 1]} : vector<8x64xf32> to vector<8x32xf32>
    %21 = arith.truncf %20 : vector<8x32xf32> to vector<8x32xbf16>
    %22 = vector.shape_cast %21 : vector<8x32xbf16> to vector<1x8x32xbf16>
    %23 = vector.extract_strided_slice %15 {offsets = [0, 32], sizes = [8, 32], strides = [1, 1]} : vector<8x64xf32> to vector<8x32xf32>
    %24 = arith.truncf %23 : vector<8x32xf32> to vector<8x32xbf16>
    %25 = vector.shape_cast %24 : vector<8x32xbf16> to vector<1x8x32xbf16>
    %26 = vector.extract_strided_slice %19 {offsets = [0, 0, 0], sizes = [1, 8, 8], strides = [1, 1, 1]} : vector<1x8x32xbf16> to vector<1x8x8xbf16>
    %27 = vector.extract_strided_slice %19 {offsets = [0, 0, 8], sizes = [1, 8, 8], strides = [1, 1, 1]} : vector<1x8x32xbf16> to vector<1x8x8xbf16>
    %28 = vector.extract_strided_slice %19 {offsets = [0, 0, 16], sizes = [1, 8, 8], strides = [1, 1, 1]} : vector<1x8x32xbf16> to vector<1x8x8xbf16>
    %29 = vector.extract_strided_slice %19 {offsets = [0, 0, 24], sizes = [1, 8, 8], strides = [1, 1, 1]} : vector<1x8x32xbf16> to vector<1x8x8xbf16>
    %30 = tpu.concatenate %26, %27, %28, %29 in 0 : vector<1x8x8xbf16>, vector<1x8x8xbf16>, vector<1x8x8xbf16>, vector<1x8x8xbf16> -> vector<4x8x8xbf16>
    %31 = vector.extract_strided_slice %22 {offsets = [0, 0, 0], sizes = [1, 8, 8], strides = [1, 1, 1]} : vector<1x8x32xbf16> to vector<1x8x8xbf16>
    %32 = vector.extract_strided_slice %22 {offsets = [0, 0, 8], sizes = [1, 8, 8], strides = [1, 1, 1]} : vector<1x8x32xbf16> to vector<1x8x8xbf16>
    %33 = vector.extract_strided_slice %22 {offsets = [0, 0, 16], sizes = [1, 8, 8], strides = [1, 1, 1]} : vector<1x8x32xbf16> to vector<1x8x8xbf16>
    %34 = vector.extract_strided_slice %22 {offsets = [0, 0, 24], sizes = [1, 8, 8], strides = [1, 1, 1]} : vector<1x8x32xbf16> to vector<1x8x8xbf16>
    %35 = tpu.concatenate %31, %32, %33, %34 in 0 : vector<1x8x8xbf16>, vector<1x8x8xbf16>, vector<1x8x8xbf16>, vector<1x8x8xbf16> -> vector<4x8x8xbf16>
    %36 = vector.extract_strided_slice %25 {offsets = [0, 0, 0], sizes = [1, 8, 8], strides = [1, 1, 1]} : vector<1x8x32xbf16> to vector<1x8x8xbf16>
    %37 = vector.extract_strided_slice %25 {offsets = [0, 0, 8], sizes = [1, 8, 8], strides = [1, 1, 1]} : vector<1x8x32xbf16> to vector<1x8x8xbf16>
    %38 = vector.extract_strided_slice %25 {offsets = [0, 0, 16], sizes = [1, 8, 8], strides = [1, 1, 1]} : vector<1x8x32xbf16> to vector<1x8x8xbf16>
    %39 = vector.extract_strided_slice %25 {offsets = [0, 0, 24], sizes = [1, 8, 8], strides = [1, 1, 1]} : vector<1x8x32xbf16> to vector<1x8x8xbf16>
    %40 = tpu.concatenate %36, %37, %38, %39 in 0 : vector<1x8x8xbf16>, vector<1x8x8xbf16>, vector<1x8x8xbf16>, vector<1x8x8xbf16> -> vector<4x8x8xbf16>
    "tpu.trace_start"() <{level = 10 : i32, message = "bqe,bke->bqk"}> : () -> ()
    %cst_15 = arith.constant dense<0.000000e+00> : vector<4x8x8xf32>
    %41 = tpu.matmul %30, %35, %cst_15 {dimension_numbers = #tpu.dot_dimension_numbers<[2], [2], [1], [1], [0, 0, 0, 1, 1, 1], [0], [0]>} : vector<4x8x8xbf16>, vector<4x8x8xbf16>, vector<4x8x8xf32> -> vector<4x8x8xf32>
    "tpu.trace_stop"() : () -> ()
    %cst_16 = arith.constant dense<0xFF800000> : vector<4x8xf32>
    %42 = vector.multi_reduction <maximumf>, %41, %cst_16 [2] : vector<4x8x8xf32> to vector<4x8xf32>
    %43 = vector.shape_cast %42 : vector<4x8xf32> to vector<4x8x1xf32>
    %44 = vector.broadcast %43 : vector<4x8x1xf32> to vector<4x8x8xf32>
    %45 = arith.subf %41, %44 : vector<4x8x8xf32>
    %46 = math.exp %45 : vector<4x8x8xf32>
    %cst_17 = arith.constant dense<0.000000e+00> : vector<4x8xf32>
    %47 = vector.multi_reduction <add>, %46, %cst_17 [2] : vector<4x8x8xf32> to vector<4x8xf32>
    %48 = vector.shape_cast %47 : vector<4x8xf32> to vector<4x8x1xf32>
    %49 = arith.truncf %46 : vector<4x8x8xf32> to vector<4x8x8xbf16>
    "tpu.trace_start"() <{level = 10 : i32, message = "bqk,bke->bqe"}> : () -> ()
    %cst_18 = arith.constant dense<0.000000e+00> : vector<4x8x8xf32>
    %50 = tpu.matmul %49, %40, %cst_18 {dimension_numbers = #tpu.dot_dimension_numbers<[2], [1], [1], [2], [0, 0, 0, 1, 1, 2], [0], [0]>} : vector<4x8x8xbf16>, vector<4x8x8xbf16>, vector<4x8x8xf32> -> vector<4x8x8xf32>
    "tpu.trace_stop"() : () -> ()
    %51 = tpu.reciprocal %48 {approx = true} : vector<4x8x1xf32> -> vector<4x8x1xf32>
    %52 = vector.broadcast %51 : vector<4x8x1xf32> to vector<4x8x8xf32>
    %53 = arith.mulf %50, %52 : vector<4x8x8xf32>
    %54 = vector.extract_strided_slice %53 {offsets = [0, 0, 0], sizes = [1, 8, 8], strides = [1, 1, 1]} : vector<4x8x8xf32> to vector<1x8x8xf32>
    %55 = vector.extract_strided_slice %53 {offsets = [1, 0, 0], sizes = [1, 8, 8], strides = [1, 1, 1]} : vector<4x8x8xf32> to vector<1x8x8xf32>
    %56 = vector.extract_strided_slice %53 {offsets = [2, 0, 0], sizes = [1, 8, 8], strides = [1, 1, 1]} : vector<4x8x8xf32> to vector<1x8x8xf32>
    %57 = vector.extract_strided_slice %53 {offsets = [3, 0, 0], sizes = [1, 8, 8], strides = [1, 1, 1]} : vector<4x8x8xf32> to vector<1x8x8xf32>
    %58 = tpu.concatenate %54, %55, %56, %57 in 2 : vector<1x8x8xf32>, vector<1x8x8xf32>, vector<1x8x8xf32>, vector<1x8x8xf32> -> vector<1x8x32xf32>
    %59 = vector.shape_cast %58 : vector<1x8x32xf32> to vector<8x32xf32>
    %60 = arith.truncf %59 : vector<8x32xf32> to vector<8x32xbf16>
    %c0_19 = arith.constant 0 : index
    %c0_20 = arith.constant 0 : index
    %61 = vector.load %arg5[%c0_19, %c0_20] : memref<32x32xbf16, #tpu.memory_space<vmem>>, vector<32x32xbf16>
    %cst_21 = arith.constant dense<0.000000e+00> : vector<8x32xf32>
    %62 = tpu.matmul %60, %61, %cst_21 {dimension_numbers = #tpu.dot_dimension_numbers<[1], [0], [0], [1], [0, 0, 1, 1], [], []>} : vector<8x32xbf16>, vector<32x32xbf16>, vector<8x32xf32> -> vector<8x32xf32>
    %c0_22 = arith.constant 0 : index
    %c0_23 = arith.constant 0 : index
    %63 = vector.load %arg9[%c0_22, %c0_23] : memref<1x32xf32, #tpu.memory_space<vmem>>, vector<1x32xf32>
    %64 = vector.broadcast %63 : vector<1x32xf32> to vector<8x32xf32>
    %65 = arith.addf %62, %64 : vector<8x32xf32>
    %66 = arith.truncf %65 : vector<8x32xf32> to vector<8x32xbf16>
    %c0_24 = arith.constant 0 : index
    %c0_25 = arith.constant 0 : index
    %67 = vector.load %arg6[%c0_24, %c0_25] : memref<32x32xbf16, #tpu.memory_space<vmem>>, vector<32x32xbf16>
    %cst_26 = arith.constant dense<0.000000e+00> : vector<8x32xf32>
    %68 = tpu.matmul %66, %67, %cst_26 {dimension_numbers = #tpu.dot_dimension_numbers<[1], [0], [0], [1], [0, 0, 1, 1], [], []>} : vector<8x32xbf16>, vector<32x32xbf16>, vector<8x32xf32> -> vector<8x32xf32>
    %c0_27 = arith.constant 0 : index
    %c0_28 = arith.constant 0 : index
    %69 = vector.load %arg10[%c0_27, %c0_28] : memref<1x32xf32, #tpu.memory_space<vmem>>, vector<1x32xf32>
    %70 = vector.broadcast %69 : vector<1x32xf32> to vector<8x32xf32>
    %71 = arith.addf %68, %70 : vector<8x32xf32>
    %cst_29 = arith.constant 0.000000e+00 : f32
    %72 = vector.broadcast %cst_29 : f32 to vector<8x32xf32>
    %73 = arith.maximumf %71, %72 : vector<8x32xf32>
    %74 = vector.shape_cast %73 : vector<8x32xf32> to vector<1x8x32xf32>
    %75 = arith.truncf %74 : vector<1x8x32xf32> to vector<1x8x32xbf16>
    %c0_30 = arith.constant 0 : index
    %c0_31 = arith.constant 0 : index
    %c0_32 = arith.constant 0 : index
    %76 = vector.load %arg11[%c0_30, %c0_31, %c0_32] : memref<1x8x32xbf16, #tpu.memory_space<vmem>>, vector<1x8x32xbf16>
    tpu.vector_store %arg11[%c0_30, %c0_31, %c0_32], %75 {strides = array<i32>} : memref<1x8x32xbf16, #tpu.memory_space<vmem>>, vector<1x8x32xbf16>,
    return
  }
  func.func @transform_0(%arg0: i32) -> (i32, i32, i32) {
    %c0_i32 = arith.constant 0 : i32
    %c0_i32_0 = arith.constant 0 : i32
    %c0_i32_1 = arith.constant 0 : i32
    return %arg0, %c0_i32, %c0_i32_0 : i32, i32, i32
  }
  func.func @transform_1(%arg0: i32) -> (i32, i32, i32) {
    %c0_i32 = arith.constant 0 : i32
    %c0_i32_0 = arith.constant 0 : i32
    %c0_i32_1 = arith.constant 0 : i32
    return %arg0, %c0_i32, %c0_i32_0 : i32, i32, i32
  }
  func.func @transform_2(%arg0: i32) -> (i32, i32) {
    %c0_i32 = arith.constant 0 : i32
    %c0_i32_0 = arith.constant 0 : i32
    %c0_i32_1 = arith.constant 0 : i32
    return %c0_i32, %c0_i32_0 : i32, i32
  }
  func.func @transform_3(%arg0: i32) -> (i32, i32) {
    %c0_i32 = arith.constant 0 : i32
    %c0_i32_0 = arith.constant 0 : i32
    %c0_i32_1 = arith.constant 0 : i32
    return %c0_i32, %c0_i32_0 : i32, i32
  }
  func.func @transform_4(%arg0: i32) -> (i32, i32) {
    %c0_i32 = arith.constant 0 : i32
    %c0_i32_0 = arith.constant 0 : i32
    %c0_i32_1 = arith.constant 0 : i32
    return %c0_i32, %c0_i32_0 : i32, i32
  }
  func.func @transform_5(%arg0: i32) -> (i32, i32) {
    %c0_i32 = arith.constant 0 : i32
    %c0_i32_0 = arith.constant 0 : i32
    %c0_i32_1 = arith.constant 0 : i32
    return %c0_i32, %c0_i32_0 : i32, i32
  }
  func.func @transform_6(%arg0: i32) -> (i32, i32) {
    %c0_i32 = arith.constant 0 : i32
    %c0_i32_0 = arith.constant 0 : i32
    %c0_i32_1 = arith.constant 0 : i32
    return %c0_i32, %c0_i32_0 : i32, i32
  }
  func.func @transform_7(%arg0: i32) -> (i32, i32) {
    %c0_i32 = arith.constant 0 : i32
    %c0_i32_0 = arith.constant 0 : i32
    %c0_i32_1 = arith.constant 0 : i32
    return %c0_i32, %c0_i32_0 : i32, i32
  }
  func.func @transform_8(%arg0: i32) -> (i32, i32) {
    %c0_i32 = arith.constant 0 : i32
    %c0_i32_0 = arith.constant 0 : i32
    %c0_i32_1 = arith.constant 0 : i32
    return %c0_i32, %c0_i32_0 : i32, i32
  }
  func.func @transform_9(%arg0: i32) -> (i32, i32) {
    %c0_i32 = arith.constant 0 : i32
    %c0_i32_0 = arith.constant 0 : i32
    %c0_i32_1 = arith.constant 0 : i32
    return %c0_i32, %c0_i32_0 : i32, i32
  }
  func.func @transform_10(%arg0: i32) -> (i32, i32, i32) {
    %c0_i32 = arith.constant 0 : i32
    %c0_i32_0 = arith.constant 0 : i32
    %c0_i32_1 = arith.constant 0 : i32
    return %arg0, %c0_i32, %c0_i32_0 : i32, i32, i32
  }
}

</mosaic_0001>

<bundles_post_ra>
// kernel: tpu_custom_call.1
= control target key start
LH: loop header
LB: loop body
LE: loop exit
PB: predicated region body
PF: predicated region fallthrough
CT: control target
= control target key end

     0   :  { %s2306_s0 = inlined_call_operand.hbm [shape: f32[2,8,32], index: 0, kind: input, shape index: {}]   ;;  %s2307_s1 = inlined_call_operand.hbm [shape: f32[2,8,32], index: 1, kind: input, shape index: {}]   ;;  %s2308_s2 = inlined_call_operand.hbm [shape: bf16[32,32], index: 2, kind: input, shape index: {}]   ;;  %s2309_s3 = inlined_call_operand.hbm [shape: bf16[32,64], index: 3, kind: input, shape index: {}]   ;;  %s2310_s4 = inlined_call_operand.hbm [shape: bf16[32,32], index: 4, kind: input, shape index: {}]   ;;  %s2311_s5 = inlined_call_operand.hbm [shape: bf16[32,32], index: 5, kind: input, shape index: {}]   ;;  %s2312_s6 = inlined_call_operand.vmem [shape: f32[1,32], index: 6, kind: input, shape index: {}]   ;;  %s2313_s7 = inlined_call_operand.vmem [shape: f32[1,64], index: 7, kind: input, shape index: {}]   ;;  %s2314_s8 = inlined_call_operand.vmem [shape: f32[1,32], index: 8, kind: input, shape index: {}]   ;;  %s2315_s9 = inlined_call_operand.vmem [shape: f32[1,32], index: 9, kind: input, shape index: {}]   ;;  %s2316_s10 = inlined_call_operand.hbm [shape: bf16[2,8,32], index: 10, kind: output, shape index: {}]  }
   0x1   :  { %2324 = sst [smem:[#allocation23_spill]] %s2308_s2 }
   0x2   :  { %2325 = sst [smem:[#allocation24_spill]] %s2309_s3 }
   0x3   :  { %2326 = sst [smem:[#allocation25_spill]] %s2310_s4 }
   0x4   :  { %2327 = sst [smem:[#allocation26_spill]] %s2311_s5 }
   0x5   :  { %15 = vsyncpa [#allocation3], 0 }
   0x6   :  { %17 = vsyncpa [#allocation3 + $0x1], 0 }
   0x7   :  { %18 = vsyncpa [#allocation6], 0 }
   0x8   :  { %20 = vsyncpa [#allocation6 + $0x1], 0 }
   0x9   :  { %21 = vsyncpa [#allocation9], 0 }
   0xa   :  { %22 = vsyncpa [#allocation12], 0 }
   0xb   :  { %23 = vsyncpa [#allocation4], 0 }
   0xc   :  { %25 = vsyncpa [#allocation4 + $0x1], 0  ;;  %s1948_s13 = smov 0   ;;  %s1950_s14 = smov 0  }
   0xd   :  { %s1952_s15 = smov 0   ;;  %s1954_s16 = smov 0  }
   0xe LB: > { %2328 = sst [smem:[#allocation20_spill]] %s1869_s15  ;;  %s1875_s17 = smov [#allocation7]   ;;  %s1873_s16 = sphi %s1954_s16, %s2353_s16   ;;  %s1869_s15 = sphi %s1952_s15, %s2355_s15   ;;  %s1865_s14 = sphi %s1950_s14, %s2357_s14   ;;  %s1861_s13 = sphi %s1948_s13, %s2356_s13  }
   0xf   : > { %s294_s18 = sshll.u32 %s1875_s17, 4  ;;  %s1969_s19 = sadd.s32 4294967295, %s1873_s16   ;;  %s295_s18 = int_to_ptr.vmem [resolvable:$true] %s294_s18 }
  0x10   : > { %p1352_p0 = scmp.ge.s32.totalorder %s1873_s16, 1  ;;  %p2320_p1 = scmp.eq.s32.totalorder %s1969_s19, 0 }
  0x11   : > { %p282_p2 = scmp.lt.s32.totalorder %s1873_s16, 3  ;;  %s1876_s21 = smov [#allocation8]  }
  0x12   : > { %s307_s22 = sshll.u32 %s1876_s21, 4  ;;  %s1877_s24 = smov [#allocation10]   ;;  %s1987_s22 = int_to_ptr.vmem [resolvable:$true] %s307_s22 }
  0x13   : > { %p1974_p3 = pnand %p1352_p0, %p282_p2  ;;  %s320_s25 = sshll.u32 %s1877_s24, 4  ;;  %s1989_s25 = int_to_ptr.vmem [resolvable:$true] %s320_s25 }
  0x14   : > { %s1644_s26 = scalar_lea.vmem %s295_s18, 256  ;;  %p1652_p11 = scmp.lt.s32.totalorder %s295_s18, %s295_s18 }
  0x15   : > { %s2329_s20 = scalar_select %p1974_p3, 1, 0 }
  0x16   : > { %p1528_p5 = pneg %p1974_p3  ;;  %p1645_p8 = scmp.ne.s32.totalorder %s295_s18, %s1644_s26 }
  0x17   : > { %p1653_p12 = scmp.lt.s32.totalorder %s1644_s26, %s1644_s26 }
  0x18   : > { %p1983_p6 = pnand %p1528_p5, %p2320_p1 }
  0x19   : > { %p1654_p13 = por %p1653_p12, %p1652_p11 }
  0x1a   : > { %p1635_p7 = pneg %p1983_p6 }
  0x1c   : > { %p1647_p9 = pnand %p1645_p8, %p1635_p7 }
  0x1e   : > { %p1648_p10 = pneg %p1647_p9 }
  0x20   : > { %p1655_p0 = pnand %p1654_p13, %p1648_p10 }
  0x22   : > { %1658 = shalt.err (!%p1655_p0)
}
  0x23   : > { %s1878_s27 = smov 64   ;;  %s1879_s28 = smov 4  }
  0x24   : > { %s2331_s2 = sld [smem:[#allocation23_spill]]  ;;  %s1670_s11 = scalar_lea.vmem %s1987_s22, 256 }
  0x25   : > { %p1671_p2 = scmp.ne.s32.totalorder %s1987_s22, %s1670_s11  ;;  %p1678_p9 = scmp.lt.s32.totalorder %s1987_s22, %s1987_s22 }
  0x26   : > { %p1679_p10 = scmp.lt.s32.totalorder %s1670_s11, %s1670_s11 }
  0x27   : > { %p1673_p5 = pnand %p1671_p2, %p1635_p7 }
  0x28   : > { %p1680_p11 = por %p1679_p10, %p1678_p9 }
  0x29   : > { %p1674_p8 = pneg %p1673_p5 }
  0x2a   : > { %1531 = dma.hbm_to_vmem [thread:$0]  (!%p1983_p6), %s2331_s2, 256, %s295_s18, [#allocation6], %s1878_s27, %s1878_s27, %s1879_s28  }
  0x2b   : > { %p1681_p12 = pnand %p1680_p11, %p1674_p8 }
  0x2d   : > { %1684 = shalt.err (!%p1681_p12)
}
  0x2e   : > { %s2332_s3 = sld [smem:[#allocation24_spill]]  ;;  %s1696_s18 = scalar_lea.vmem %s1989_s25, 256 }
  0x2f   : > { %p1697_p13 = scmp.ne.s32.totalorder %s1989_s25, %s1696_s18  ;;  %p1704_p5 = scmp.lt.s32.totalorder %s1989_s25, %s1989_s25 }
  0x30   : > { %p1705_p8 = scmp.lt.s32.totalorder %s1696_s18, %s1696_s18 }
  0x31   : > { %p1699_p0 = pnand %p1697_p13, %p1635_p7 }
  0x32   : > { %p1706_p9 = por %p1705_p8, %p1704_p5 }
  0x33   : > { %p1700_p2 = pneg %p1699_p0 }
  0x34   : > { %1534 = dma.hbm_to_vmem [thread:$0]  (!%p1983_p6), %s2332_s3, 256, %s1987_s22, [#allocation9], %s1878_s27, %s1878_s27, %s1879_s28  }
  0x35   : > { %p1707_p10 = pnand %p1706_p9, %p1700_p2 }
  0x37   : > { %1710 = shalt.err (!%p1707_p10)
}
  0x38   : > { %s2333_s4 = sld [smem:[#allocation25_spill]]  ;;  %s1880_s24 = smov [#allocation11]  }
  0x39   : > { %s333_s26 = sshll.u32 %s1880_s24, 4  ;;  %s334_s26 = int_to_ptr.vmem [resolvable:$true] %s333_s26 }
  0x3a   : > { %s1722_s29 = scalar_lea.vmem %s334_s26, 256  ;;  %p1730_p0 = scmp.lt.s32.totalorder %s334_s26, %s334_s26 }
  0x3b   : > { %p1723_p11 = scmp.ne.s32.totalorder %s334_s26, %s1722_s29  ;;  %p1731_p2 = scmp.lt.s32.totalorder %s1722_s29, %s1722_s29 }
  0x3d   : > { %p1725_p12 = pnand %p1723_p11, %p1635_p7  ;;  %p1732_p5 = por %p1731_p2, %p1730_p0 }
  0x3e   : > { %1537 = dma.hbm_to_vmem [thread:$0]  (!%p1983_p6), %s2333_s4, 256, %s1989_s25, [#allocation9], %s1878_s27, %s1878_s27, %s1879_s28  }
  0x3f   : > { %p1726_p13 = pneg %p1725_p12 }
  0x41   : > { %p1733_p8 = pnand %p1732_p5, %p1726_p13 }
  0x43   : > { %1736 = shalt.err (!%p1733_p8)
}
  0x44   : > { %s2334_s5 = sld [smem:[#allocation26_spill]]  ;;  %s1351_s23 = sadd.s32 4294967294, %s1873_s16  }
  0x45   : > { %s2049_s11 = sadd.s32 1, %s1873_s16   ;;  %s38_s17 = sadd.s32 1, %s1869_s15 }
  0x46   : > { %2335 = sst [smem:[#allocation21_spill]] %s2049_s11  ;;  %s35_s12 = ssub.s32 %s1873_s16, %s2049_s11 }
  0x47   : > { %p36_p7 = scmp.eq.s32.totalorder %s35_s12, 0  ;;  %p45_p9 = scmp.ne.s32.totalorder %s1869_s15, %s1865_s14 }
  0x48   : > { %p46_p10 = scmp.eq.s32.totalorder %s1873_s16, 0  ;;  %p51_p11 = scmp.ne.s32.totalorder %s1865_s14, %s1861_s13 }
  0x49   : > { %s2060_s18 = scalar_select %p36_p7, %s1869_s15, %s38_s17  }
  0x4a   : > { %1540 = dma.hbm_to_vmem [thread:$0]  (!%p1983_p6), %s2334_s5, 256, %s334_s26, [#allocation12], %s1878_s27, %s1878_s27, %s1879_s28  }
  0x4b   : > { %2336 = sst [smem:[#allocation22_spill]] %s2060_s18  ;;  %p2062_p12 = por %p46_p10, %p45_p9 }
  0x4c   : > { %p2068_p6 = por %p2320_p1, %p51_p11  ;;  %p269_p13 = scmp.eq.s32.totalorder %s1969_s19, 1 }
  0x4d   : > { %p275_p0 = scmp.eq.s32.totalorder %s1351_s23, 1  ;;  %p1556_p2 = scmp.lt.s32.totalorder %s1873_s16, 2 }
  0x4e   : > { %s2338_s27 = scalar_select %p2068_p6, 1, 0 }
  0x4f   : > { %s359_s28 = sand.u32 1, %s1869_s15   ;;  %p2075_p5 = por %p269_p13, %p45_p9 }
  0x50   : > { %p2079_p8 = por %p275_p0, %p51_p11  ;;  %s2083_s26 = sshll.u32 %s359_s28, 3 }
  0x51   : > { %s2339_s22 = scalar_select %p2075_p5, 1, 0 }
  0x52   : > { %s2340_s24 = scalar_select %p2079_p8, 1, 0 }
  0x53   : > { %s1359_s29 = sshll.u32 %s1873_s16, 7  ;;  %s363_s23 = scalar_lea.vmem [#allocation2], %s2083_s26 }
  0x54   : > { %s2089_s12 = scalar_lea.hbm %s2306_s0, %s1359_s29  ;;  %s370_s17 = sshll.u32 %s363_s23, 4  ;;  %s2092_s17 = int_to_ptr.vmem [resolvable:$true] %s370_s17 }
  0x55   : > { %p2096_p7 = pnand %p1556_p2, %p2062_p12  ;;  %s2103_s25 = scalar_lea.hbm %s2307_s1, %s1359_s29 }
  0x56   : > { %s377_s30 = sand.u32 1, %s1873_s16   ;;  %s360_s5 = scalar_lea.sflag [#allocation3], %s359_s28 }
  0x57   : > { %s1737_s18 = scalar_lea.hbm %s2089_s12, 128  ;;  %p1739_p10 = pneg %p2096_p7 }
  0x58   : > { %p1738_p9 = scmp.ne.s32.totalorder %s2089_s12, %s1737_s18  ;;  %s1742_s15 = scalar_lea.hbm %s2306_s0, 256 }
  0x59   : > { %p1743_p13 = scmp.lt.s32.totalorder %s2089_s12, %s2306_s0  ;;  %p1744_p0 = scmp.lt.s32.totalorder %s1742_s15, %s1737_s18 }
  0x5a   : > { %p1740_p11 = pnand %p1739_p10, %p1738_p9 }
  0x5b   : > { %p1745_p2 = por %p1744_p0, %p1743_p13 }
  0x5c   : > { %p1741_p12 = pneg %p1740_p11 }
  0x5e   : > { %p1746_p4 = pnand %p1745_p2, %p1741_p12 }
  0x60   : > { %1749 = shalt.err (!%p1746_p4)
}
  0x61   : > { %s1750_s4 = scalar_lea.vmem %s2092_s17, 128  ;;  %s1881_s28 = smov [#allocation2]  }
  0x62   : > { %p1751_p1 = scmp.ne.s32.totalorder %s2092_s17, %s1750_s4  ;;  %s1755_s29 = sshll.u32 %s1881_s28, 4  ;;  %s1756_s29 = int_to_ptr.vmem [resolvable:$false] %s1755_s29 }
  0x63   : > { %s1757_s21 = scalar_lea.vmem %s1756_s29, 256  ;;  %p1758_p8 = scmp.lt.s32.totalorder %s2092_s17, %s1756_s29 }
  0x64   : > { %p1753_p9 = pnand %p1751_p1, %p1739_p10  ;;  %p1759_p5 = scmp.lt.s32.totalorder %s1757_s21, %s1750_s4 }
  0x66   : > { %p1754_p11 = pneg %p1753_p9  ;;  %p1760_p6 = por %p1759_p5, %p1758_p8 }
  0x68   : > { %p1761_p13 = pnand %p1760_p6, %p1754_p11 }
  0x6a   : > { %1764 = shalt.err (!%p1761_p13)
}
  0x6b   : > { %1544 = dma.hbm_to_vmem [thread:$0]  (!%p2096_p7), %s2089_s12, 128, %s2092_s17, %s360_s5  }
  0x6c   : > { %s381_s15 = scalar_lea.vmem [#allocation5], %s2083_s26  ;;  %s378_s18 = scalar_lea.sflag [#allocation6], %s377_s30 }
  0x6d   : > { %s388_s11 = sshll.u32 %s381_s15, 4  ;;  %s1765_s23 = scalar_lea.hbm %s2103_s25, 128  ;;  %s389_s11 = int_to_ptr.vmem [resolvable:$true] %s388_s11 }
  0x6e   : > { %p1766_p1 = scmp.ne.s32.totalorder %s2103_s25, %s1765_s23  ;;  %s1770_s28 = scalar_lea.hbm %s2307_s1, 256 }
  0x6f   : > { %p1771_p5 = scmp.lt.s32.totalorder %s2103_s25, %s2307_s1  ;;  %p1772_p8 = scmp.lt.s32.totalorder %s1770_s28, %s1765_s23 }
  0x70   : > { %p1768_p4 = pnand %p1766_p1, %p1739_p10 }
  0x71   : > { %p1773_p12 = por %p1772_p8, %p1771_p5 }
  0x72   : > { %p1769_p6 = pneg %p1768_p4 }
  0x74   : > { %p1774_p0 = pnand %p1773_p12, %p1769_p6 }
  0x76   : > { %1777 = shalt.err (!%p1774_p0)
}
  0x77   : > { %s1778_s5 = scalar_lea.vmem %s389_s11, 128  ;;  %s1882_s26 = smov [#allocation5]  }
  0x78   : > { %p1779_p2 = scmp.ne.s32.totalorder %s389_s11, %s1778_s5  ;;  %s1783_s12 = sshll.u32 %s1882_s26, 4  ;;  %s1784_s12 = int_to_ptr.vmem [resolvable:$false] %s1783_s12 }
  0x79   : > { %s1785_s17 = scalar_lea.vmem %s1784_s12, 256  ;;  %p1786_p13 = scmp.lt.s32.totalorder %s389_s11, %s1784_s12 }
  0x7a   : > { %p1781_p9 = pnand %p1779_p2, %p1739_p10  ;;  %p1787_p1 = scmp.lt.s32.totalorder %s1785_s17, %s1778_s5 }
  0x7c   : > { %p1782_p11 = pneg %p1781_p9  ;;  %p1788_p4 = por %p1787_p1, %p1786_p13 }
  0x7e   : > { %p1789_p3 = pnand %p1788_p4, %p1782_p11 }
  0x80   : > { %1792 = shalt.err (!%p1789_p3)
}
  0x81   : > { %1547 = dma.hbm_to_vmem [thread:$0]  (!%p2096_p7), %s2103_s25, 128, %s389_s11, %s378_s18  }
  0x82   : > { %p2342_p6 = scmp.ne.s32.totalorder %s2329_s20, 0 }
  0x83   : > { %s2154_s30 = sand.u32 (!%p2342_p6), 1, %s1865_s14   ;;  %p2343_p10 = scmp.ne.s32.totalorder (!%p2342_p6), %s2338_s27, 0 }
  0x84   : > { %397 = sbr.rel (%p2342_p6) target bundleno = 1562 (0x61a), region = 60  ;;  %s1363_s15 = sshll.u32 (!%p2342_p6), %s2154_s30, 3 }
  0x85   : > { %s400_s23 = scalar_lea.sflag (!%p2342_p6), [#allocation3], %s2154_s30  ;;  %s403_s3 = scalar_lea.vmem (!%p2342_p6), [#allocation2], %s1363_s15 }
  0x89   : > { %1836 = dma.done.wait (%p2343_p10), %s400_s23, 128  }
  0x8a   : > { %1838 = vsyncadd (%p2343_p10), %s400_s23, 4294967168  ;;  %s408_s2 = sand.u32 1, %s1969_s19   ;;  %s412_s20 = scalar_lea.vmem [#allocation5], %s1363_s15 }
  0x8b   : > { %s409_s25 = scalar_lea.sflag [#allocation6], %s408_s2 }
  0x8c   : > { %1840 = dma.done.wait (%p2343_p10), %s409_s25, 128  }
  0x8d   : > { %1842 = vsyncadd (%p2343_p10), %s409_s25, 4294967168  ;;  %p2344_p3 = scmp.eq.s32.totalorder %s1969_s19, 0 }
  0x8f   : > { %1844 = dma.done.wait (%p2344_p3), [#allocation6], 256   ;;  %p2345_p7 = pmov %p2344_p3 }
  0x90   : > { %p2346_p5 = pmov %p2344_p3 }
  0x91   : > { %1846 = vsyncadd (%p2345_p7), [#allocation6], 4294967040 }
  0x92   : > { %1848 = dma.done.wait (%p2346_p5), [#allocation9], 512   ;;  %p2347_p8 = pmov %p2344_p3 }
  0x93   : > { %p2348_p12 = pmov %p2344_p3 }
  0x94   : > { %1850 = vsyncadd (%p2347_p8), [#allocation9], 4294966784 }
  0x95   : > { %1852 = dma.done.wait (%p2348_p12), [#allocation12], 256   ;;  %p2349_p0 = pmov %p2344_p3 }
  0x96   : > { %v1883_v0 = vmov 0.0   ;;  %vm1884_vm0 = vmmov 0   ;;  %v1609_v1 = vld [vmem:[#allocation7 + $0x8] sm:$0xff]   ;;  %v1610_v2 = vld [vmem:[#allocation8 + $0x8] sm:$0xff]   ;;  %v1611_v3 = vld [vmem:[#allocation7] sm:$0xff]   ;;  %vm498_vm1 = vcmask 261120  }
  0x97   : > { %1854 = vsyncadd (%p2349_p0), [#allocation12], 4294967040  ;;  %1426 = vmatprep.subr.bf16.mxu0 %v1883_v0  ;;  %1434 = vmatprep.subr.bf16.mxu1 %v1883_v0  ;;  %v1612_v4 = vld [vmem:[#allocation8] sm:$0xff]   ;;  %v471_v5 = vld [vmem:[%s403_s3] sm:$0xff]  ;;  %vm625_vm2 = vcmask 64512   ;;  %s1885_s28 = smov 120  }
  0x98   : > { %1430 = vmatprep.mubr.msk.bf16.mxu0 %vm1884_vm0, %v1883_v0  ;;  %1438 = vmatprep.mubr.msk.bf16.mxu1 %vm1884_vm0, %v1883_v0  ;;  %v473_v6 = vld [vmem:[%s412_s20] sm:$0xff]  ;;  %v472_v7 = vpack.c.bf16 %v471_v5, %v471_v5  ;;  %v1370_v9 = vld [vmem:[%s2312_s6] ss:$0 sm:$0xff]  ;;  %s1886_s29 = smov 112   ;;  %s1887_s21 = smov 104   ;;  %vm855_vm3 = vcmask 1043456  }
  0x99   : > { %1427 = vmatpush3.bf16.msra.mxu0 %v1609_v1  ;;  %1435 = vmatpush3.bf16.msra.mxu1 %v1610_v2  ;;  %v474_v8 = vpack.c.bf16 %v473_v6, %v473_v6  ;;  %v1374_v10 = vld [vmem:[%s2313_s7] ss:$0 sm:$0xff]  ;;  %s1888_s5 = smov 96   ;;  %s1889_s26 = smov 8   ;;  %vm1064_vm4 = vcmask 130048   ;;  %vm1066_vm5 = vcmask 195584  }
  0x9a   : > { %1428 = vmatprep.subr.bf16.mxu0 %v1883_v0  ;;  %1436 = vmatprep.subr.bf16.mxu1 %v1883_v0  ;;  %s1890_s12 = smov 16   ;;  %s1891_s17 = smov 24   ;;  %vm1204_vm6 = vcmask 257024  }
  0x9b   : > { %s1369_s3 = sshll.u32 %s2154_s30, 2  ;;  %s1395_s20 = sshll.u32 %s1969_s19, 6 }
  0x9c   : > { %s469_s27 = scalar_lea.vmem [#allocation13], %s1369_s3  ;;  %p2350_p9 = scmp.ne.s32.totalorder %s2339_s22, 0 }
  0x9d   : > { %1429 = vmatpush3.bf16.msra.mxu0 %v1611_v3  ;;  %1437 = vmatpush3.bf16.msra.mxu1 %v1612_v4  ;;  %s1220_s11 = sshll.u32 %s469_s27, 4  ;;  %s1892_s19 = smov [#allocation13]   ;;  %s1221_s11 = int_to_ptr.vmem [resolvable:$true] %s1220_s11 }
  0x9e   : > { %1442 = vmatprep.subr.bf16.mxu0 %v1883_v0  ;;  %1448 = vmatprep.subr.bf16.mxu1 %v1883_v0 }
  0xa0   : > { %1431 = vmatmul.mubr.msk.bf16.vlgmr.msra.gmra.mxu0 %vm498_vm1, %v472_v7  ;;  %1439 = vmatmul.mubr.msk.bf16.vlgmr.msra.gmra.mxu1 %vm498_vm1, %v474_v8 }
  0xa1   : > { %1444 = vmatprep.mubr.msk.bf16.mxu0 %vm1884_vm0, %v1883_v0  ;;  %1450 = vmatprep.mubr.msk.bf16.mxu1 %vm1884_vm0, %v1883_v0 }
 0x160   : > { %v536_v11 = vpop.f32.mrf.mxu0  ;;  %v602_v13 = vpop.f32.mrf.mxu1 }
 0x161   : > { %v537_v12 = vadd.f32 %v1370_v9, %v536_v11  ;;  %v603_v14 = vadd.f32 %v1374_v10, %v602_v13 }
 0x162   : > { %v1432_v15 = vpop.f32.mrf.mxu0  ;;  %v1440_v17 = vpop.f32.mrf.mxu1 }
 0x163   : > { %v608_v16 = vmul.f32 0.35355338, %v537_v12  ;;  %v610_v18 = vpack.c.bf16 %v603_v14, %v603_v14 }
 0x164   : > { %v539_v19 = vpop.f32.mrf.mxu0  ;;  %v605_v21 = vpop.f32.mrf.mxu1 }
 0x165   : > { %v609_v20 = vpack.c.bf16 %v608_v16, %v608_v16  ;;  %619 = vrot.lane.b32.xlu0 %v610_v18, %s1885_s28  ;;  %v630_v23 = vsel %vm625_vm2, %v610_v18, 0 }
 0x166   : > { %v1433_v22 = vpop.f32.mrf.mxu0  ;;  %v1441_v24 = vpop.f32.mrf.mxu1  ;;  %1443 = vmatpush3.bf16.xpose.msra.mxu0 %v630_v23 }
 0x167   : > { %612 = vrot.lane.b32.xlu1 %v609_v20, %s1885_s28  ;;  %1454 = vmatprep.subr.bf16.mxu0 %v1883_v0  ;;  %s2269_s28 = scalar_lea.hbm %s2316_s10, %s1395_s20 }
 0x169   : > { %621 = vrot.lane.b32.xlu0 %v610_v18, %s1886_s29 }
 0x16b   : > { %623 = vrot.lane.b32.xlu1 %v610_v18, %s1887_s21 }
 0x16d   : > { %614 = vrot.lane.b32.xlu0 %v609_v20, %s1886_s29  ;;  %1445 = vmatmul.mubr.msk.bf16.vlgmr.msra.gmra.mxu0 %vm625_vm2, %v609_v20  ;;  %s1207_s29 = scalar_lea.sflag [#allocation4], %s2154_s30 }
 0x16e   : > { %1456 = vmatprep.mubr.msk.bf16.mxu0 %vm1884_vm0, %v1883_v0 }
 0x16f   : > { %616 = vrot.lane.b32.xlu1 %v609_v20, %s1887_s21  ;;  %s1793_s21 = scalar_lea.vmem %s1221_s11, 64 }
 0x170   : > { %p1794_p2 = scmp.ne.s32.totalorder %s1221_s11, %s1793_s21 }
 0x172   : > { %p1795_p11 = pnand %p1794_p2, %p2350_p9 }
 0x173   : > { %850 = vrot.lane.b32.xlu1 %v610_v18, %s1888_s5 }
 0x174   : > { %p1796_p13 = pneg %p1795_p11 }
 0x1d7   : > { %v620_v25 = vpop.permute.xlu0 %619 }
 0x1d8   : > { %v676_v26 = vsel %vm625_vm2, %v620_v25, 0 }
 0x1d9   : > { %v613_v27 = vpop.permute.xlu1 %612  ;;  %1449 = vmatpush3.bf16.xpose.msra.mxu1 %v676_v26 }
 0x1da   : > { %1460 = vmatprep.subr.bf16.mxu1 %v1883_v0 }
 0x1db   : > { %v622_v28 = vpop.permute.xlu0 %621 }
 0x1dc   : > { %v722_v29 = vsel %vm625_vm2, %v622_v28, 0 }
 0x1dd   : > { %v624_v30 = vpop.permute.xlu1 %623  ;;  %1455 = vmatpush3.bf16.xpose.msra.mxu0 %v722_v29 }
 0x1de   : > { %1466 = vmatprep.subr.bf16.mxu0 %v1883_v0  ;;  %v768_v31 = vsel %vm625_vm2, %v624_v30, 0 }
 0x1df   : > { %v615_v33 = vpop.permute.xlu0 %614 }
 0x1e0   : > { %1451 = vmatmul.mubr.msk.bf16.vlgmr.msra.gmra.mxu1 %vm625_vm2, %v613_v27 }
 0x1e1   : > { %v617_v32 = vpop.permute.xlu1 %616  ;;  %1461 = vmatpush3.bf16.xpose.msra.mxu1 %v768_v31  ;;  %1462 = vmatprep.mubr.msk.bf16.mxu1 %vm1884_vm0, %v1883_v0  ;;  %v1614_v31 = vld [vmem:[#allocation10] sm:$0xff]  }
 0x1e2   : > { %1472 = vmatprep.subr.bf16.mxu1 %v1883_v0 }
 0x1e4   : > { %1457 = vmatmul.mubr.msk.bf16.vlgmr.msra.gmra.mxu0 %vm625_vm2, %v615_v33 }
 0x1e5   : > { %v851_v34 = vpop.permute.xlu1 %850  ;;  %1468 = vmatprep.mubr.msk.bf16.mxu0 %vm1884_vm0, %v1883_v0 }
 0x1e6   : > { %v857_v35 = vsel %vm855_vm3, %v851_v34, 0 }
 0x1e7   : > { %1467 = vmatpush3.bf16.msra.mxu0 %v857_v35  ;;  %v1615_v35 = vld [vmem:[#allocation11 + $0x8] sm:$0xff]  }
 0x1e8   : > { %1478 = vmatprep.subr.bf16.mxu0 %v1883_v0  ;;  %1463 = vmatmul.mubr.msk.bf16.vlgmr.msra.gmra.mxu1 %vm625_vm2, %v617_v32 }
 0x1e9   : > { %1474 = vmatprep.mubr.msk.bf16.mxu1 %vm1884_vm0, %v1883_v0 }
 0x22d   : > { %v666_v36 = vpop.f32.mrf.mxu0 }
 0x22e   : > { %v810_v37 = vsel %vm625_vm2, %v666_v36, -inf }
 0x22f   : > { %811 = vmax.xlane.f32.xlu0 %v810_v37  ;;  %v1446_v38 = vpop.f32.mrf.mxu0 }
 0x231   : > { %v669_v39 = vpop.f32.mrf.mxu0 }
 0x233   : > { %v1447_v40 = vpop.f32.mrf.mxu0 }
 0x2a0   : > { %v712_v41 = vpop.f32.mrf.mxu1 }
 0x2a1   : > { %v813_v42 = vsel %vm625_vm2, %v712_v41, -inf }
 0x2a2   : > { %814 = vmax.xlane.f32.xlu1 %v813_v42  ;;  %v1452_v43 = vpop.f32.mrf.mxu1 }
 0x2a4   : > { %v715_v44 = vpop.f32.mrf.mxu1  ;;  %v758_v45 = vpop.f32.mrf.mxu0 }
 0x2a5   : > { %v816_v46 = vsel %vm625_vm2, %v758_v45, -inf }
 0x2a6   : > { %v1453_v47 = vpop.f32.mrf.mxu1  ;;  %817 = vmax.xlane.f32.xlu0 %v816_v46  ;;  %v1458_v48 = vpop.f32.mrf.mxu0 }
 0x2a8   : > { %v761_v49 = vpop.f32.mrf.mxu0  ;;  %v804_v50 = vpop.f32.mrf.mxu1 }
 0x2a9   : > { %v819_v51 = vsel %vm625_vm2, %v804_v50, -inf }
 0x2aa   : > { %v1464_v52 = vpop.f32.mrf.mxu1  ;;  %820 = vmax.xlane.f32.xlu0 %v819_v51  ;;  %v1459_v53 = vpop.f32.mrf.mxu0 }
 0x2ac   : > { %v807_v54 = vpop.f32.mrf.mxu1 }
 0x2ae   : > { %v1465_v55 = vpop.f32.mrf.mxu1 }
 0x2b3   : > { %947 = vrot.lane.b32.xlu1 %v622_v28, %s1888_s5 }
 0x2b7   : > { %995 = vrot.lane.b32.xlu1 %v624_v30, %s1888_s5  ;;  %v1613_v30 = vld [vmem:[#allocation10 + $0x8] sm:$0xff]  }
 0x2b8   : > { %v812_v56 = vpop.xlane.xlu0 %811 }
 0x2b9   : > { %v822_v57 = vsub.f32 %v666_v36, %v812_v56 }
 0x2bb   : > { %v826_v58 = vmul.f32 1.442695, %v822_v57 }
 0x2bd   : > { %1617 = vpow2.f32 %v826_v58 }
 0x2c0   : > { %899 = vrot.lane.b32.xlu0 %v620_v25, %s1888_s5  ;;  %s1797_s5 = sshll.u32 %s1892_s19, 4  ;;  %s1798_s5 = int_to_ptr.vmem [resolvable:$false] %s1797_s5 }
 0x2c1   : > { %p1800_p1 = scmp.lt.s32.totalorder %s1221_s11, %s1798_s5 }
 0x2ca   : > { %v1618_v59 = vpop.eup %1617 }
 0x2cb   : > { %v846_v60 = vpack.c.bf16 %v1618_v59, %v1618_v59  ;;  %v834_v22 = vsel %vm625_vm2, %v1618_v59, 0.0 }
 0x2cd   : > { %1469 = vmatmul.mubr.msk.bf16.vlgmr.msra.gmra.mxu0 %vm625_vm2, %v846_v60  ;;  %v1616_v60 = vld [vmem:[#allocation11] sm:$0xff]  }
 0x2ce   : > { %1480 = vmatprep.mubr.msk.bf16.mxu0 %vm1884_vm0, %v1883_v0 }
 0x32b   : > { %v815_v61 = vpop.xlane.xlu1 %814 }
 0x32c   : > { %v823_v62 = vsub.f32 %v712_v41, %v815_v61  ;;  %v1386_v61 = vld [vmem:[%s2314_s8] ss:$0 sm:$0xff] }
 0x32e   : > { %v828_v63 = vmul.f32 1.442695, %v823_v62 }
 0x32f   : > { %v948_v1 = vpop.permute.xlu1 %947  ;;  %v818_v2 = vpop.xlane.xlu0 %817 }
 0x330   : > { %1619 = vpow2.f32 %v828_v63  ;;  %v953_v3 = vsel %vm855_vm3, %v948_v1, 0  ;;  %v824_v4 = vsub.f32 %v758_v45, %v818_v2 }
 0x331   : > { %1479 = vmatpush3.bf16.msra.mxu0 %v953_v3 }
 0x332   : > { %v830_v5 = vmul.f32 1.442695, %v824_v4  ;;  %1490 = vmatprep.subr.bf16.mxu0 %v1883_v0 }
 0x333   : > { %v821_v6 = vpop.xlane.xlu0 %820  ;;  %v996_v12 = vpop.permute.xlu1 %995 }
 0x334   : > { %1621 = vpow2.f32 %v830_v5  ;;  %v825_v7 = vsub.f32 %v804_v50, %v821_v6  ;;  %v1001_v15 = vsel %vm855_vm3, %v996_v12, 0  ;;  %v1390_v5 = vld [vmem:[%s2315_s9] ss:$0 sm:$0xff] }
 0x336   : > { %v832_v8 = vmul.f32 1.442695, %v825_v7 }
 0x337   : > { %v900_v9 = vpop.permute.xlu0 %899 }
 0x338   : > { %1623 = vpow2.f32 %v832_v8  ;;  %v905_v10 = vsel %vm855_vm3, %v900_v9, 0 }
 0x339   : > { %1473 = vmatpush3.bf16.msra.mxu1 %v905_v10 }
 0x33a   : > { %1484 = vmatprep.subr.bf16.mxu1 %v1883_v0 }
 0x33d   : > { %v1620_v11 = vpop.eup %1619 }
 0x33e   : > { %v837_v13 = vsel %vm625_vm2, %v1620_v11, 0.0  ;;  %v847_v14 = vpack.c.bf16 %v1620_v11, %v1620_v11 }
 0x33f   : > { %838 = vadd.xlane.f32.xlu0 %v837_v13 }
 0x340   : > { %1475 = vmatmul.mubr.msk.bf16.vlgmr.msra.gmra.mxu1 %vm625_vm2, %v847_v14 }
 0x341   : > { %v1622_v16 = vpop.eup %1621  ;;  %1485 = vmatpush3.bf16.msra.mxu1 %v1001_v15  ;;  %1486 = vmatprep.mubr.msk.bf16.mxu1 %vm1884_vm0, %v1883_v0 }
 0x342   : > { %v840_v17 = vsel %vm625_vm2, %v1622_v16, 0.0  ;;  %v848_v18 = vpack.c.bf16 %v1622_v16, %v1622_v16  ;;  %1498 = vmatprep.subr.bf16.mxu1 %v1883_v0 }
 0x343   : > { %841 = vadd.xlane.f32.xlu1 %v840_v17 }
 0x344   : > { %1481 = vmatmul.mubr.msk.bf16.vlgmr.msra.gmra.mxu0 %vm625_vm2, %v848_v18 }
 0x345   : > { %v1624_v19 = vpop.eup %1623  ;;  %1494 = vmatprep.mubr.msk.bf16.mxu0 %vm1884_vm0, %v1883_v0  ;;  %1491 = vmatpush3.bf16.msra.mxu0 %v1613_v30 }
 0x346   : > { %v843_v20 = vsel %vm625_vm2, %v1624_v19, 0.0  ;;  %v849_v21 = vpack.c.bf16 %v1624_v19, %v1624_v19  ;;  %1492 = vmatprep.subr.bf16.mxu0 %v1883_v0 }
 0x347   : > { %844 = vadd.xlane.f32.xlu0 %v843_v20 }
 0x348   : > { %1487 = vmatmul.mubr.msk.bf16.vlgmr.msra.gmra.mxu1 %vm625_vm2, %v849_v21 }
 0x349   : > { %1502 = vmatprep.mubr.msk.bf16.mxu1 %vm1884_vm0, %v1883_v0  ;;  %1493 = vmatpush3.bf16.msra.mxu0 %v1614_v31 }
 0x34a   : > { %1499 = vmatpush3.bf16.msra.mxu1 %v1615_v35 }
 0x34b   : > { %835 = vadd.xlane.f32.xlu0 %v834_v22  ;;  %1500 = vmatprep.subr.bf16.mxu1 %v1883_v0 }
 0x34e   : > { %1501 = vmatpush3.bf16.msra.mxu1 %v1616_v60 }
 0x38d   : > { %v893_v23 = vpop.f32.mrf.mxu0 }
 0x38f   : > { %v1470_v24 = vpop.f32.mrf.mxu0 }
 0x391   : > { %v896_v25 = vpop.f32.mrf.mxu0 }
 0x393   : > { %v1471_v26 = vpop.f32.mrf.mxu0 }
 0x3c8   : > { %v839_v27 = vpop.xlane.xlu0 %838 }
 0x3c9   : > { %1625 = vrcp.f32 %v839_v27 }
 0x3cc   : > { %v842_v28 = vpop.xlane.xlu1 %841 }
 0x3cd   : > { %1627 = vrcp.f32 %v842_v28 }
 0x3d0   : > { %v845_v29 = vpop.xlane.xlu0 %844 }
 0x3d1   : > { %1629 = vrcp.f32 %v845_v29 }
 0x3d4   : > { %v836_v51 = vpop.xlane.xlu0 %835 }
 0x3d5   : > { %1631 = vrcp.f32 %v836_v51 }
 0x3d6   : > { %v1626_v32 = vpop.eup %1625 }
 0x3da   : > { %v1628_v37 = vpop.eup %1627 }
 0x3de   : > { %v1630_v43 = vpop.eup %1629 }
 0x3e2   : > { %v1632_v52 = vpop.eup %1631 }
 0x3e3   : > { %v1047_v0 = vmul.f32 %v1632_v52, %v893_v23 }
 0x400   : > { %v941_v33 = vpop.f32.mrf.mxu1 }
 0x401   : > { %v1048_v34 = vmul.f32 %v1626_v32, %v941_v33 }
 0x402   : > { %v1476_v36 = vpop.f32.mrf.mxu1 }
 0x403   : > { %1052 = vrot.lane.b32.xlu1 %v1048_v34, %s1889_s26  ;;  %s1799_s26 = scalar_lea.vmem %s1798_s5, 128 }
 0x404   : > { %v944_v38 = vpop.f32.mrf.mxu1  ;;  %v989_v39 = vpop.f32.mrf.mxu0  ;;  %p1801_p4 = scmp.lt.s32.totalorder %s1799_s26, %s1793_s21 }
 0x405   : > { %v1049_v40 = vmul.f32 %v1628_v37, %v989_v39 }
 0x406   : > { %v1477_v41 = vpop.f32.mrf.mxu1  ;;  %v1482_v42 = vpop.f32.mrf.mxu0  ;;  %p1802_p6 = por %p1801_p4, %p1800_p1 }
 0x407   : > { %1056 = vrot.lane.b32.xlu0 %v1049_v40, %s1890_s12 }
 0x408   : > { %v992_v44 = vpop.f32.mrf.mxu0  ;;  %v1037_v45 = vpop.f32.mrf.mxu1  ;;  %p1803_p10 = pnand %p1802_p6, %p1796_p13 }
 0x409   : > { %v1050_v46 = vmul.f32 %v1630_v43, %v1037_v45 }
 0x40a   : > { %v1483_v47 = vpop.f32.mrf.mxu0  ;;  %v1488_v48 = vpop.f32.mrf.mxu1 }
 0x40b   : > { %1060 = vrot.lane.b32.xlu1 %v1050_v46, %s1891_s17 }
 0x40c   : > { %v1040_v49 = vpop.f32.mrf.mxu1 }
 0x40e   : > { %v1489_v50 = vpop.f32.mrf.mxu1 }
 0x475   : > { %v1053_v53 = vpop.permute.xlu1 %1052 }
 0x476   : > { %v1063_v55 = vsel %vm625_vm2, %v1047_v0, %v1053_v53 }
 0x479   : > { %v1057_v54 = vpop.permute.xlu0 %1056 }
 0x47a   : > { %v1065_v56 = vsel %vm1064_vm4, %v1063_v55, %v1057_v54 }
 0x47d   : > { %v1061_v57 = vpop.permute.xlu1 %1060 }
 0x47e   : > { %v1067_v58 = vsel %vm1066_vm5, %v1065_v56, %v1061_v57 }
 0x47f   : > { %v1068_v59 = vpack.c.bf16 %v1067_v58, %v1067_v58 }
 0x481   : > { %1495 = vmatmul.mubr.msk.bf16.vlgmr.msra.gmra.mxu0 %vm498_vm1, %v1068_v59 }
 0x541   : > { %v1129_v62 = vpop.f32.mrf.mxu0 }
 0x542   : > { %v1130_v63 = vadd.f32 %v1386_v61, %v1129_v62 }
 0x543   : > { %v1496_v1 = vpop.f32.mrf.mxu0 }
 0x544   : > { %v1135_v2 = vpack.c.bf16 %v1130_v63, %v1130_v63 }
 0x545   : > { %v1132_v3 = vpop.f32.mrf.mxu0 }
 0x546   : > { %1503 = vmatmul.mubr.msk.bf16.vlgmr.msra.gmra.mxu1 %vm498_vm1, %v1135_v2 }
 0x547   : > { %v1497_v4 = vpop.f32.mrf.mxu0 }
 0x606   : > { %v1196_v6 = vpop.f32.mrf.mxu1 }
 0x607   : > { %v1197_v7 = vadd.f32 %v1390_v5, %v1196_v6 }
 0x608   : > { %v1504_v8 = vpop.f32.mrf.mxu1 }
 0x609   : > { %v1202_v9 = vmax.f32 %v1197_v7, 0.0 }
 0x60a   : > { %v1199_v10 = vpop.f32.mrf.mxu1 }
 0x60b   : > { %v1203_v11 = vpack.c.bf16 %v1202_v9, %v1202_v9 }
 0x60c   : > { %v1505_v12 = vpop.f32.mrf.mxu1 }
 0x60d   : > { %1205 = vst.msk [vmem:[%s469_s27] sm:$0xf] %vm1204_vm6, %v1203_v11 }
 0x60e   : > { %1806 = shalt.err (!%p1803_p10)
}
 0x60f   : > { %s1807_s12 = scalar_lea.hbm %s2269_s28, 64  ;;  %s1811_s15 = scalar_lea.hbm %s2316_s10, 128 }
 0x610   : > { %p1808_p3 = scmp.ne.s32.totalorder %s2269_s28, %s1807_s12  ;;  %p1812_p8 = scmp.lt.s32.totalorder %s2269_s28, %s2316_s10 }
 0x611   : > { %p1813_p12 = scmp.lt.s32.totalorder %s1811_s15, %s1807_s12 }
 0x612   : > { %p1809_p7 = pnand %p1808_p3, %p2350_p9 }
 0x613   : > { %p1814_p0 = por %p1813_p12, %p1812_p8 }
 0x614   : > { %p1810_p5 = pneg %p1809_p7 }
 0x616   : > { %p1815_p2 = pnand %p1814_p0, %p1810_p5 }
 0x618   : > { %1818 = shalt.err (!%p1815_p2)
}
 0x619   : > { %1526 = dma.vmem_to_hbm [thread:$0]  (%p2350_p9), %s1221_s11, 64, %s2269_s28, %s1207_s29  }
 0x61a PF: > { %s1232_s2 = sand.u32 1, %s1861_s13   ;;  %p2351_p11 = scmp.ne.s32.totalorder %s2340_s24, 0 }
 0x61b   : > { %p2352_p13 = scmp.ge.s32.totalorder %s1873_s16, 2  ;;  %s1233_s25 = scalar_lea.sflag [#allocation4], %s1232_s2 }
 0x61d   : > { %p1549_p1 = pnand %p2352_p13, %p2351_p11 }
 0x61f   : > { %p1550_p4 = pneg %p1549_p1 }
 0x621   : > { %1856 = dma.done.wait (%p1550_p4), %s1233_s25, 64  }
 0x622   : > { %1858 = vsyncadd (%p1550_p4), %s1233_s25, 4294967232  ;;  %s2353_s16 = sld [smem:[#allocation21_spill]]  ;;  %s2356_s13 = smov %s1865_s14 }
 0x623   : > { %s2354_s20 = sld [smem:[#allocation20_spill]] }
 0x624   : > { %s2355_s15 = sld [smem:[#allocation22_spill]] }
 0x628   : > { %p28_p6 = scmp.ge.s32.totalorder %s2353_s16, 4  }
 0x629   : > { %s2357_s14 = smov %s2354_s20 }
 0x62a   :  { %30 = sbr.rel (!%p28_p6) target bundleno = 14 (0xe), region = 134 }
 0x62f   :  { %1238 = vsyncpa [#allocation3], 1 }
 0x630   :  { %1240 = vsyncpa [#allocation3 + $0x1], 1 }
 0x631   :  { %1241 = vsyncpa [#allocation6], 1 }
 0x632   :  { %1243 = vsyncpa [#allocation6 + $0x1], 1 }
 0x633   :  { %1244 = vsyncpa [#allocation9], 1 }
 0x634   :  { %1245 = vsyncpa [#allocation12], 1 }
 0x635   :  { %1246 = vsyncpa [#allocation4], 1 }
 0x636   :  { %1248 = vsyncpa [#allocation4 + $0x1], 1 }

// kernel: tpu_custom_call.1
= control target key start
LH: loop header
LB: loop body
LE: loop exit
PB: predicated region body
PF: predicated region fallthrough
CT: control target
= control target key end

     0   :  { %s2306_s0 = inlined_call_operand.hbm [shape: f32[2,8,32], index: 0, kind: input, shape index: {}]   ;;  %s2307_s1 = inlined_call_operand.hbm [shape: f32[2,8,32], index: 1, kind: input, shape index: {}]   ;;  %s2308_s2 = inlined_call_operand.hbm [shape: bf16[32,32], index: 2, kind: input, shape index: {}]   ;;  %s2309_s3 = inlined_call_operand.hbm [shape: bf16[32,64], index: 3, kind: input, shape index: {}]   ;;  %s2310_s4 = inlined_call_operand.hbm [shape: bf16[32,32], index: 4, kind: input, shape index: {}]   ;;  %s2311_s5 = inlined_call_operand.hbm [shape: bf16[32,32], index: 5, kind: input, shape index: {}]   ;;  %s2312_s6 = inlined_call_operand.vmem [shape: f32[1,32], index: 6, kind: input, shape index: {}]   ;;  %s2313_s7 = inlined_call_operand.vmem [shape: f32[1,64], index: 7, kind: input, shape index: {}]   ;;  %s2314_s8 = inlined_call_operand.vmem [shape: f32[1,32], index: 8, kind: input, shape index: {}]   ;;  %s2315_s9 = inlined_call_operand.vmem [shape: f32[1,32], index: 9, kind: input, shape index: {}]   ;;  %s2316_s10 = inlined_call_operand.hbm [shape: bf16[2,8,32], index: 10, kind: output, shape index: {}]  }
   0x1   :  { %2324 = sst [smem:[#allocation23_spill]] %s2308_s2 }
   0x2   :  { %2325 = sst [smem:[#allocation24_spill]] %s2309_s3 }
   0x3   :  { %2326 = sst [smem:[#allocation25_spill]] %s2310_s4 }
   0x4   :  { %2327 = sst [smem:[#allocation26_spill]] %s2311_s5 }
   0x5   :  { %15 = vsyncpa [#allocation3], 0 }
   0x6   :  { %17 = vsyncpa [#allocation3 + $0x1], 0 }
   0x7   :  { %18 = vsyncpa [#allocation6], 0 }
   0x8   :  { %20 = vsyncpa [#allocation6 + $0x1], 0 }
   0x9   :  { %21 = vsyncpa [#allocation9], 0 }
   0xa   :  { %22 = vsyncpa [#allocation12], 0 }
   0xb   :  { %23 = vsyncpa [#allocation4], 0 }
   0xc   :  { %25 = vsyncpa [#allocation4 + $0x1], 0  ;;  %s1948_s13 = smov 0   ;;  %s1950_s14 = smov 0  }
   0xd   :  { %s1952_s15 = smov 0   ;;  %s1954_s16 = smov 0  }
   0xe LB: > { %2328 = sst [smem:[#allocation20_spill]] %s1869_s15  ;;  %s1875_s17 = smov [#allocation7]   ;;  %s1873_s16 = sphi %s1954_s16, %s2353_s16   ;;  %s1869_s15 = sphi %s1952_s15, %s2355_s15   ;;  %s1865_s14 = sphi %s1950_s14, %s2357_s14   ;;  %s1861_s13 = sphi %s1948_s13, %s2356_s13  }
   0xf   : > { %s294_s18 = sshll.u32 %s1875_s17, 4  ;;  %s1969_s19 = sadd.s32 4294967295, %s1873_s16   ;;  %s295_s18 = int_to_ptr.vmem [resolvable:$true] %s294_s18 }
  0x10   : > { %p1352_p0 = scmp.ge.s32.totalorder %s1873_s16, 1  ;;  %p2320_p1 = scmp.eq.s32.totalorder %s1969_s19, 0 }
  0x11   : > { %p282_p2 = scmp.lt.s32.totalorder %s1873_s16, 3  ;;  %s1876_s21 = smov [#allocation8]  }
  0x12   : > { %s307_s22 = sshll.u32 %s1876_s21, 4  ;;  %s1877_s24 = smov [#allocation10]   ;;  %s1987_s22 = int_to_ptr.vmem [resolvable:$true] %s307_s22 }
  0x13   : > { %p1974_p3 = pnand %p1352_p0, %p282_p2  ;;  %s320_s25 = sshll.u32 %s1877_s24, 4  ;;  %s1989_s25 = int_to_ptr.vmem [resolvable:$true] %s320_s25 }
  0x14   : > { %s1644_s26 = scalar_lea.vmem %s295_s18, 256  ;;  %p1652_p11 = scmp.lt.s32.totalorder %s295_s18, %s295_s18 }
  0x15   : > { %s2329_s20 = scalar_select %p1974_p3, 1, 0 }
  0x16   : > { %p1528_p5 = pneg %p1974_p3  ;;  %p1645_p8 = scmp.ne.s32.totalorder %s295_s18, %s1644_s26 }
  0x17   : > { %p1653_p12 = scmp.lt.s32.totalorder %s1644_s26, %s1644_s26 }
  0x18   : > { %p1983_p6 = pnand %p1528_p5, %p2320_p1 }
  0x19   : > { %p1654_p13 = por %p1653_p12, %p1652_p11 }
  0x1a   : > { %p1635_p7 = pneg %p1983_p6 }
  0x1c   : > { %p1647_p9 = pnand %p1645_p8, %p1635_p7 }
  0x1e   : > { %p1648_p10 = pneg %p1647_p9 }
  0x20   : > { %p1655_p0 = pnand %p1654_p13, %p1648_p10 }
  0x22   : > { %1658 = shalt.err (!%p1655_p0)
}
  0x23   : > { %s1878_s27 = smov 64   ;;  %s1879_s28 = smov 4  }
  0x24   : > { %s2331_s2 = sld [smem:[#allocation23_spill]]  ;;  %s1670_s11 = scalar_lea.vmem %s1987_s22, 256 }
  0x25   : > { %p1671_p2 = scmp.ne.s32.totalorder %s1987_s22, %s1670_s11  ;;  %p1678_p9 = scmp.lt.s32.totalorder %s1987_s22, %s1987_s22 }
  0x26   : > { %p1679_p10 = scmp.lt.s32.totalorder %s1670_s11, %s1670_s11 }
  0x27   : > { %p1673_p5 = pnand %p1671_p2, %p1635_p7 }
  0x28   : > { %p1680_p11 = por %p1679_p10, %p1678_p9 }
  0x29   : > { %p1674_p8 = pneg %p1673_p5 }
  0x2a   : > { %1531 = dma.hbm_to_vmem [thread:$0]  (!%p1983_p6), %s2331_s2, 256, %s295_s18, [#allocation6], %s1878_s27, %s1878_s27, %s1879_s28  }
  0x2b   : > { %p1681_p12 = pnand %p1680_p11, %p1674_p8 }
  0x2d   : > { %1684 = shalt.err (!%p1681_p12)
}
  0x2e   : > { %s2332_s3 = sld [smem:[#allocation24_spill]]  ;;  %s1696_s18 = scalar_lea.vmem %s1989_s25, 256 }
  0x2f   : > { %p1697_p13 = scmp.ne.s32.totalorder %s1989_s25, %s1696_s18  ;;  %p1704_p5 = scmp.lt.s32.totalorder %s1989_s25, %s1989_s25 }
  0x30   : > { %p1705_p8 = scmp.lt.s32.totalorder %s1696_s18, %s1696_s18 }
  0x31   : > { %p1699_p0 = pnand %p1697_p13, %p1635_p7 }
  0x32   : > { %p1706_p9 = por %p1705_p8, %p1704_p5 }
  0x33   : > { %p1700_p2 = pneg %p1699_p0 }
  0x34   : > { %1534 = dma.hbm_to_vmem [thread:$0]  (!%p1983_p6), %s2332_s3, 256, %s1987_s22, [#allocation9], %s1878_s27, %s1878_s27, %s1879_s28  }
  0x35   : > { %p1707_p10 = pnand %p1706_p9, %p1700_p2 }
  0x37   : > { %1710 = shalt.err (!%p1707_p10)
}
  0x38   : > { %s2333_s4 = sld [smem:[#allocation25_spill]]  ;;  %s1880_s24 = smov [#allocation11]  }
  0x39   : > { %s333_s26 = sshll.u32 %s1880_s24, 4  ;;  %s334_s26 = int_to_ptr.vmem [resolvable:$true] %s333_s26 }
  0x3a   : > { %s1722_s29 = scalar_lea.vmem %s334_s26, 256  ;;  %p1730_p0 = scmp.lt.s32.totalorder %s334_s26, %s334_s26 }
  0x3b   : > { %p1723_p11 = scmp.ne.s32.totalorder %s334_s26, %s1722_s29  ;;  %p1731_p2 = scmp.lt.s32.totalorder %s1722_s29, %s1722_s29 }
  0x3d   : > { %p1725_p12 = pnand %p1723_p11, %p1635_p7  ;;  %p1732_p5 = por %p1731_p2, %p1730_p0 }
  0x3e   : > { %1537 = dma.hbm_to_vmem [thread:$0]  (!%p1983_p6), %s2333_s4, 256, %s1989_s25, [#allocation9], %s1878_s27, %s1878_s27, %s1879_s28  }
  0x3f   : > { %p1726_p13 = pneg %p1725_p12 }
  0x41   : > { %p1733_p8 = pnand %p1732_p5, %p1726_p13 }
  0x43   : > { %1736 = shalt.err (!%p1733_p8)
}
  0x44   : > { %s2334_s5 = sld [smem:[#allocation26_spill]]  ;;  %s1351_s23 = sadd.s32 4294967294, %s1873_s16  }
  0x45   : > { %s2049_s11 = sadd.s32 1, %s1873_s16   ;;  %s38_s17 = sadd.s32 1, %s1869_s15 }
  0x46   : > { %2335 = sst [smem:[#allocation21_spill]] %s2049_s11  ;;  %s35_s12 = ssub.s32 %s1873_s16, %s2049_s11 }
  0x47   : > { %p36_p7 = scmp.eq.s32.totalorder %s35_s12, 0  ;;  %p45_p9 = scmp.ne.s32.totalorder %s1869_s15, %s1865_s14 }
  0x48   : > { %p46_p10 = scmp.eq.s32.totalorder %s1873_s16, 0  ;;  %p51_p11 = scmp.ne.s32.totalorder %s1865_s14, %s1861_s13 }
  0x49   : > { %s2060_s18 = scalar_select %p36_p7, %s1869_s15, %s38_s17  }
  0x4a   : > { %1540 = dma.hbm_to_vmem [thread:$0]  (!%p1983_p6), %s2334_s5, 256, %s334_s26, [#allocation12], %s1878_s27, %s1878_s27, %s1879_s28  }
  0x4b   : > { %2336 = sst [smem:[#allocation22_spill]] %s2060_s18  ;;  %p2062_p12 = por %p46_p10, %p45_p9 }
  0x4c   : > { %p2068_p6 = por %p2320_p1, %p51_p11  ;;  %p269_p13 = scmp.eq.s32.totalorder %s1969_s19, 1 }
  0x4d   : > { %p275_p0 = scmp.eq.s32.totalorder %s1351_s23, 1  ;;  %p1556_p2 = scmp.lt.s32.totalorder %s1873_s16, 2 }
  0x4e   : > { %s2338_s27 = scalar_select %p2068_p6, 1, 0 }
  0x4f   : > { %s359_s28 = sand.u32 1, %s1869_s15   ;;  %p2075_p5 = por %p269_p13, %p45_p9 }
  0x50   : > { %p2079_p8 = por %p275_p0, %p51_p11  ;;  %s2083_s26 = sshll.u32 %s359_s28, 3 }
  0x51   : > { %s2339_s22 = scalar_select %p2075_p5, 1, 0 }
  0x52   : > { %s2340_s24 = scalar_select %p2079_p8, 1, 0 }
  0x53   : > { %s1359_s29 = sshll.u32 %s1873_s16, 7  ;;  %s363_s23 = scalar_lea.vmem [#allocation2], %s2083_s26 }
  0x54   : > { %s2089_s12 = scalar_lea.hbm %s2306_s0, %s1359_s29  ;;  %s370_s17 = sshll.u32 %s363_s23, 4  ;;  %s2092_s17 = int_to_ptr.vmem [resolvable:$true] %s370_s17 }
  0x55   : > { %p2096_p7 = pnand %p1556_p2, %p2062_p12  ;;  %s2103_s25 = scalar_lea.hbm %s2307_s1, %s1359_s29 }
  0x56   : > { %s377_s30 = sand.u32 1, %s1873_s16   ;;  %s360_s5 = scalar_lea.sflag [#allocation3], %s359_s28 }
  0x57   : > { %s1737_s18 = scalar_lea.hbm %s2089_s12, 128  ;;  %p1739_p10 = pneg %p2096_p7 }
  0x58   : > { %p1738_p9 = scmp.ne.s32.totalorder %s2089_s12, %s1737_s18  ;;  %s1742_s15 = scalar_lea.hbm %s2306_s0, 256 }
  0x59   : > { %p1743_p13 = scmp.lt.s32.totalorder %s2089_s12, %s2306_s0  ;;  %p1744_p0 = scmp.lt.s32.totalorder %s1742_s15, %s1737_s18 }
  0x5a   : > { %p1740_p11 = pnand %p1739_p10, %p1738_p9 }
  0x5b   : > { %p1745_p2 = por %p1744_p0, %p1743_p13 }
  0x5c   : > { %p1741_p12 = pneg %p1740_p11 }
  0x5e   : > { %p1746_p4 = pnand %p1745_p2, %p1741_p12 }
  0x60   : > { %1749 = shalt.err (!%p1746_p4)
}
  0x61   : > { %s1750_s4 = scalar_lea.vmem %s2092_s17, 128  ;;  %s1881_s28 = smov [#allocation2]  }
  0x62   : > { %p1751_p1 = scmp.ne.s32.totalorder %s2092_s17, %s1750_s4  ;;  %s1755_s29 = sshll.u32 %s1881_s28, 4  ;;  %s1756_s29 = int_to_ptr.vmem [resolvable:$false] %s1755_s29 }
  0x63   : > { %s1757_s21 = scalar_lea.vmem %s1756_s29, 256  ;;  %p1758_p8 = scmp.lt.s32.totalorder %s2092_s17, %s1756_s29 }
  0x64   : > { %p1753_p9 = pnand %p1751_p1, %p1739_p10  ;;  %p1759_p5 = scmp.lt.s32.totalorder %s1757_s21, %s1750_s4 }
  0x66   : > { %p1754_p11 = pneg %p1753_p9  ;;  %p1760_p6 = por %p1759_p5, %p1758_p8 }
  0x68   : > { %p1761_p13 = pnand %p1760_p6, %p1754_p11 }
  0x6a   : > { %1764 = shalt.err (!%p1761_p13)
}
  0x6b   : > { %1544 = dma.hbm_to_vmem [thread:$0]  (!%p2096_p7), %s2089_s12, 128, %s2092_s17, %s360_s5  }
  0x6c   : > { %s381_s15 = scalar_lea.vmem [#allocation5], %s2083_s26  ;;  %s378_s18 = scalar_lea.sflag [#allocation6], %s377_s30 }
  0x6d   : > { %s388_s11 = sshll.u32 %s381_s15, 4  ;;  %s1765_s23 = scalar_lea.hbm %s2103_s25, 128  ;;  %s389_s11 = int_to_ptr.vmem [resolvable:$true] %s388_s11 }
  0x6e   : > { %p1766_p1 = scmp.ne.s32.totalorder %s2103_s25, %s1765_s23  ;;  %s1770_s28 = scalar_lea.hbm %s2307_s1, 256 }
  0x6f   : > { %p1771_p5 = scmp.lt.s32.totalorder %s2103_s25, %s2307_s1  ;;  %p1772_p8 = scmp.lt.s32.totalorder %s1770_s28, %s1765_s23 }
  0x70   : > { %p1768_p4 = pnand %p1766_p1, %p1739_p10 }
  0x71   : > { %p1773_p12 = por %p1772_p8, %p1771_p5 }
  0x72   : > { %p1769_p6 = pneg %p1768_p4 }
  0x74   : > { %p1774_p0 = pnand %p1773_p12, %p1769_p6 }
  0x76   : > { %1777 = shalt.err (!%p1774_p0)
}
  0x77   : > { %s1778_s5 = scalar_lea.vmem %s389_s11, 128  ;;  %s1882_s26 = smov [#allocation5]  }
  0x78   : > { %p1779_p2 = scmp.ne.s32.totalorder %s389_s11, %s1778_s5  ;;  %s1783_s12 = sshll.u32 %s1882_s26, 4  ;;  %s1784_s12 = int_to_ptr.vmem [resolvable:$false] %s1783_s12 }
  0x79   : > { %s1785_s17 = scalar_lea.vmem %s1784_s12, 256  ;;  %p1786_p13 = scmp.lt.s32.totalorder %s389_s11, %s1784_s12 }
  0x7a   : > { %p1781_p9 = pnand %p1779_p2, %p1739_p10  ;;  %p1787_p1 = scmp.lt.s32.totalorder %s1785_s17, %s1778_s5 }
  0x7c   : > { %p1782_p11 = pneg %p1781_p9  ;;  %p1788_p4 = por %p1787_p1, %p1786_p13 }
  0x7e   : > { %p1789_p3 = pnand %p1788_p4, %p1782_p11 }
  0x80   : > { %1792 = shalt.err (!%p1789_p3)
}
  0x81   : > { %1547 = dma.hbm_to_vmem [thread:$0]  (!%p2096_p7), %s2103_s25, 128, %s389_s11, %s378_s18  }
  0x82   : > { %p2342_p6 = scmp.ne.s32.totalorder %s2329_s20, 0 }
  0x83   : > { %s2154_s30 = sand.u32 (!%p2342_p6), 1, %s1865_s14   ;;  %p2343_p10 = scmp.ne.s32.totalorder (!%p2342_p6), %s2338_s27, 0 }
  0x84   : > { %397 = sbr.rel (%p2342_p6) target bundleno = 1562 (0x61a), region = 60  ;;  %s1363_s15 = sshll.u32 (!%p2342_p6), %s2154_s30, 3 }
  0x85   : > { %s400_s23 = scalar_lea.sflag (!%p2342_p6), [#allocation3], %s2154_s30  ;;  %s403_s3 = scalar_lea.vmem (!%p2342_p6), [#allocation2], %s1363_s15 }
  0x89   : > { %1836 = dma.done.wait (%p2343_p10), %s400_s23, 128  }
  0x8a   : > { %1838 = vsyncadd (%p2343_p10), %s400_s23, 4294967168  ;;  %s408_s2 = sand.u32 1, %s1969_s19   ;;  %s412_s20 = scalar_lea.vmem [#allocation5], %s1363_s15 }
  0x8b   : > { %s409_s25 = scalar_lea.sflag [#allocation6], %s408_s2 }
  0x8c   : > { %1840 = dma.done.wait (%p2343_p10), %s409_s25, 128  }
  0x8d   : > { %1842 = vsyncadd (%p2343_p10), %s409_s25, 4294967168  ;;  %p2344_p3 = scmp.eq.s32.totalorder %s1969_s19, 0 }
  0x8f   : > { %1844 = dma.done.wait (%p2344_p3), [#allocation6], 256   ;;  %p2345_p7 = pmov %p2344_p3 }
  0x90   : > { %p2346_p5 = pmov %p2344_p3 }
  0x91   : > { %1846 = vsyncadd (%p2345_p7), [#allocation6], 4294967040 }
  0x92   : > { %1848 = dma.done.wait (%p2346_p5), [#allocation9], 512   ;;  %p2347_p8 = pmov %p2344_p3 }
  0x93   : > { %p2348_p12 = pmov %p2344_p3 }
  0x94   : > { %1850 = vsyncadd (%p2347_p8), [#allocation9], 4294966784 }
  0x95   : > { %1852 = dma.done.wait (%p2348_p12), [#allocation12], 256   ;;  %p2349_p0 = pmov %p2344_p3 }
  0x96   : > { %v1883_v0 = vmov 0.0   ;;  %vm1884_vm0 = vmmov 0   ;;  %v1609_v1 = vld [vmem:[#allocation7 + $0x8] sm:$0xff]   ;;  %v1610_v2 = vld [vmem:[#allocation8 + $0x8] sm:$0xff]   ;;  %v1611_v3 = vld [vmem:[#allocation7] sm:$0xff]   ;;  %vm498_vm1 = vcmask 261120  }
  0x97   : > { %1854 = vsyncadd (%p2349_p0), [#allocation12], 4294967040  ;;  %1426 = vmatprep.subr.bf16.mxu0 %v1883_v0  ;;  %1434 = vmatprep.subr.bf16.mxu1 %v1883_v0  ;;  %v1612_v4 = vld [vmem:[#allocation8] sm:$0xff]   ;;  %v471_v5 = vld [vmem:[%s403_s3] sm:$0xff]  ;;  %vm625_vm2 = vcmask 64512   ;;  %s1885_s28 = smov 120  }
  0x98   : > { %1430 = vmatprep.mubr.msk.bf16.mxu0 %vm1884_vm0, %v1883_v0  ;;  %1438 = vmatprep.mubr.msk.bf16.mxu1 %vm1884_vm0, %v1883_v0  ;;  %v473_v6 = vld [vmem:[%s412_s20] sm:$0xff]  ;;  %v472_v7 = vpack.c.bf16 %v471_v5, %v471_v5  ;;  %v1370_v9 = vld [vmem:[%s2312_s6] ss:$0 sm:$0xff]  ;;  %s1886_s29 = smov 112   ;;  %s1887_s21 = smov 104   ;;  %vm855_vm3 = vcmask 1043456  }
  0x99   : > { %1427 = vmatpush3.bf16.msra.mxu0 %v1609_v1  ;;  %1435 = vmatpush3.bf16.msra.mxu1 %v1610_v2  ;;  %v474_v8 = vpack.c.bf16 %v473_v6, %v473_v6  ;;  %v1374_v10 = vld [vmem:[%s2313_s7] ss:$0 sm:$0xff]  ;;  %s1888_s5 = smov 96   ;;  %s1889_s26 = smov 8   ;;  %vm1064_vm4 = vcmask 130048   ;;  %vm1066_vm5 = vcmask 195584  }
  0x9a   : > { %1428 = vmatprep.subr.bf16.mxu0 %v1883_v0  ;;  %1436 = vmatprep.subr.bf16.mxu1 %v1883_v0  ;;  %s1890_s12 = smov 16   ;;  %s1891_s17 = smov 24   ;;  %vm1204_vm6 = vcmask 257024  }
  0x9b   : > { %s1369_s3 = sshll.u32 %s2154_s30, 2  ;;  %s1395_s20 = sshll.u32 %s1969_s19, 6 }
  0x9c   : > { %s469_s27 = scalar_lea.vmem [#allocation13], %s1369_s3  ;;  %p2350_p9 = scmp.ne.s32.totalorder %s2339_s22, 0 }
  0x9d   : > { %1429 = vmatpush3.bf16.msra.mxu0 %v1611_v3  ;;  %1437 = vmatpush3.bf16.msra.mxu1 %v1612_v4  ;;  %s1220_s11 = sshll.u32 %s469_s27, 4  ;;  %s1892_s19 = smov [#allocation13]   ;;  %s1221_s11 = int_to_ptr.vmem [resolvable:$true] %s1220_s11 }
  0x9e   : > { %1442 = vmatprep.subr.bf16.mxu0 %v1883_v0  ;;  %1448 = vmatprep.subr.bf16.mxu1 %v1883_v0 }
  0xa0   : > { %1431 = vmatmul.mubr.msk.bf16.vlgmr.msra.gmra.mxu0 %vm498_vm1, %v472_v7  ;;  %1439 = vmatmul.mubr.msk.bf16.vlgmr.msra.gmra.mxu1 %vm498_vm1, %v474_v8 }
  0xa1   : > { %1444 = vmatprep.mubr.msk.bf16.mxu0 %vm1884_vm0, %v1883_v0  ;;  %1450 = vmatprep.mubr.msk.bf16.mxu1 %vm1884_vm0, %v1883_v0 }
 0x160   : > { %v536_v11 = vpop.f32.mrf.mxu0  ;;  %v602_v13 = vpop.f32.mrf.mxu1 }
 0x161   : > { %v537_v12 = vadd.f32 %v1370_v9, %v536_v11  ;;  %v603_v14 = vadd.f32 %v1374_v10, %v602_v13 }
 0x162   : > { %v1432_v15 = vpop.f32.mrf.mxu0  ;;  %v1440_v17 = vpop.f32.mrf.mxu1 }
 0x163   : > { %v608_v16 = vmul.f32 0.35355338, %v537_v12  ;;  %v610_v18 = vpack.c.bf16 %v603_v14, %v603_v14 }
 0x164   : > { %v539_v19 = vpop.f32.mrf.mxu0  ;;  %v605_v21 = vpop.f32.mrf.mxu1 }
 0x165   : > { %v609_v20 = vpack.c.bf16 %v608_v16, %v608_v16  ;;  %619 = vrot.lane.b32.xlu0 %v610_v18, %s1885_s28  ;;  %v630_v23 = vsel %vm625_vm2, %v610_v18, 0 }
 0x166   : > { %v1433_v22 = vpop.f32.mrf.mxu0  ;;  %v1441_v24 = vpop.f32.mrf.mxu1  ;;  %1443 = vmatpush3.bf16.xpose.msra.mxu0 %v630_v23 }
 0x167   : > { %612 = vrot.lane.b32.xlu1 %v609_v20, %s1885_s28  ;;  %1454 = vmatprep.subr.bf16.mxu0 %v1883_v0  ;;  %s2269_s28 = scalar_lea.hbm %s2316_s10, %s1395_s20 }
 0x169   : > { %621 = vrot.lane.b32.xlu0 %v610_v18, %s1886_s29 }
 0x16b   : > { %623 = vrot.lane.b32.xlu1 %v610_v18, %s1887_s21 }
 0x16d   : > { %614 = vrot.lane.b32.xlu0 %v609_v20, %s1886_s29  ;;  %1445 = vmatmul.mubr.msk.bf16.vlgmr.msra.gmra.mxu0 %vm625_vm2, %v609_v20  ;;  %s1207_s29 = scalar_lea.sflag [#allocation4], %s2154_s30 }
 0x16e   : > { %1456 = vmatprep.mubr.msk.bf16.mxu0 %vm1884_vm0, %v1883_v0 }
 0x16f   : > { %616 = vrot.lane.b32.xlu1 %v609_v20, %s1887_s21  ;;  %s1793_s21 = scalar_lea.vmem %s1221_s11, 64 }
 0x170   : > { %p1794_p2 = scmp.ne.s32.totalorder %s1221_s11, %s1793_s21 }
 0x172   : > { %p1795_p11 = pnand %p1794_p2, %p2350_p9 }
 0x173   : > { %850 = vrot.lane.b32.xlu1 %v610_v18, %s1888_s5 }
 0x174   : > { %p1796_p13 = pneg %p1795_p11 }
 0x1d7   : > { %v620_v25 = vpop.permute.xlu0 %619 }
 0x1d8   : > { %v676_v26 = vsel %vm625_vm2, %v620_v25, 0 }
 0x1d9   : > { %v613_v27 = vpop.permute.xlu1 %612  ;;  %1449 = vmatpush3.bf16.xpose.msra.mxu1 %v676_v26 }
 0x1da   : > { %1460 = vmatprep.subr.bf16.mxu1 %v1883_v0 }
 0x1db   : > { %v622_v28 = vpop.permute.xlu0 %621 }
 0x1dc   : > { %v722_v29 = vsel %vm625_vm2, %v622_v28, 0 }
 0x1dd   : > { %v624_v30 = vpop.permute.xlu1 %623  ;;  %1455 = vmatpush3.bf16.xpose.msra.mxu0 %v722_v29 }
 0x1de   : > { %1466 = vmatprep.subr.bf16.mxu0 %v1883_v0  ;;  %v768_v31 = vsel %vm625_vm2, %v624_v30, 0 }
 0x1df   : > { %v615_v33 = vpop.permute.xlu0 %614 }
 0x1e0   : > { %1451 = vmatmul.mubr.msk.bf16.vlgmr.msra.gmra.mxu1 %vm625_vm2, %v613_v27 }
 0x1e1   : > { %v617_v32 = vpop.permute.xlu1 %616  ;;  %1461 = vmatpush3.bf16.xpose.msra.mxu1 %v768_v31  ;;  %1462 = vmatprep.mubr.msk.bf16.mxu1 %vm1884_vm0, %v1883_v0  ;;  %v1614_v31 = vld [vmem:[#allocation10] sm:$0xff]  }
 0x1e2   : > { %1472 = vmatprep.subr.bf16.mxu1 %v1883_v0 }
 0x1e4   : > { %1457 = vmatmul.mubr.msk.bf16.vlgmr.msra.gmra.mxu0 %vm625_vm2, %v615_v33 }
 0x1e5   : > { %v851_v34 = vpop.permute.xlu1 %850  ;;  %1468 = vmatprep.mubr.msk.bf16.mxu0 %vm1884_vm0, %v1883_v0 }
 0x1e6   : > { %v857_v35 = vsel %vm855_vm3, %v851_v34, 0 }
 0x1e7   : > { %1467 = vmatpush3.bf16.msra.mxu0 %v857_v35  ;;  %v1615_v35 = vld [vmem:[#allocation11 + $0x8] sm:$0xff]  }
 0x1e8   : > { %1478 = vmatprep.subr.bf16.mxu0 %v1883_v0  ;;  %1463 = vmatmul.mubr.msk.bf16.vlgmr.msra.gmra.mxu1 %vm625_vm2, %v617_v32 }
 0x1e9   : > { %1474 = vmatprep.mubr.msk.bf16.mxu1 %vm1884_vm0, %v1883_v0 }
 0x22d   : > { %v666_v36 = vpop.f32.mrf.mxu0 }
 0x22e   : > { %v810_v37 = vsel %vm625_vm2, %v666_v36, -inf }
 0x22f   : > { %811 = vmax.xlane.f32.xlu0 %v810_v37  ;;  %v1446_v38 = vpop.f32.mrf.mxu0 }
 0x231   : > { %v669_v39 = vpop.f32.mrf.mxu0 }
 0x233   : > { %v1447_v40 = vpop.f32.mrf.mxu0 }
 0x2a0   : > { %v712_v41 = vpop.f32.mrf.mxu1 }
 0x2a1   : > { %v813_v42 = vsel %vm625_vm2, %v712_v41, -inf }
 0x2a2   : > { %814 = vmax.xlane.f32.xlu1 %v813_v42  ;;  %v1452_v43 = vpop.f32.mrf.mxu1 }
 0x2a4   : > { %v715_v44 = vpop.f32.mrf.mxu1  ;;  %v758_v45 = vpop.f32.mrf.mxu0 }
 0x2a5   : > { %v816_v46 = vsel %vm625_vm2, %v758_v45, -inf }
 0x2a6   : > { %v1453_v47 = vpop.f32.mrf.mxu1  ;;  %817 = vmax.xlane.f32.xlu0 %v816_v46  ;;  %v1458_v48 = vpop.f32.mrf.mxu0 }
 0x2a8   : > { %v761_v49 = vpop.f32.mrf.mxu0  ;;  %v804_v50 = vpop.f32.mrf.mxu1 }
 0x2a9   : > { %v819_v51 = vsel %vm625_vm2, %v804_v50, -inf }
 0x2aa   : > { %v1464_v52 = vpop.f32.mrf.mxu1  ;;  %820 = vmax.xlane.f32.xlu0 %v819_v51  ;;  %v1459_v53 = vpop.f32.mrf.mxu0 }
 0x2ac   : > { %v807_v54 = vpop.f32.mrf.mxu1 }
 0x2ae   : > { %v1465_v55 = vpop.f32.mrf.mxu1 }
 0x2b3   : > { %947 = vrot.lane.b32.xlu1 %v622_v28, %s1888_s5 }
 0x2b7   : > { %995 = vrot.lane.b32.xlu1 %v624_v30, %s1888_s5  ;;  %v1613_v30 = vld [vmem:[#allocation10 + $0x8] sm:$0xff]  }
 0x2b8   : > { %v812_v56 = vpop.xlane.xlu0 %811 }
 0x2b9   : > { %v822_v57 = vsub.f32 %v666_v36, %v812_v56 }
 0x2bb   : > { %v826_v58 = vmul.f32 1.442695, %v822_v57 }
 0x2bd   : > { %1617 = vpow2.f32 %v826_v58 }
 0x2c0   : > { %899 = vrot.lane.b32.xlu0 %v620_v25, %s1888_s5  ;;  %s1797_s5 = sshll.u32 %s1892_s19, 4  ;;  %s1798_s5 = int_to_ptr.vmem [resolvable:$false] %s1797_s5 }
 0x2c1   : > { %p1800_p1 = scmp.lt.s32.totalorder %s1221_s11, %s1798_s5 }
 0x2ca   : > { %v1618_v59 = vpop.eup %1617 }
 0x2cb   : > { %v846_v60 = vpack.c.bf16 %v1618_v59, %v1618_v59  ;;  %v834_v22 = vsel %vm625_vm2, %v1618_v59, 0.0 }
 0x2cd   : > { %1469 = vmatmul.mubr.msk.bf16.vlgmr.msra.gmra.mxu0 %vm625_vm2, %v846_v60  ;;  %v1616_v60 = vld [vmem:[#allocation11] sm:$0xff]  }
 0x2ce   : > { %1480 = vmatprep.mubr.msk.bf16.mxu0 %vm1884_vm0, %v1883_v0 }
 0x32b   : > { %v815_v61 = vpop.xlane.xlu1 %814 }
 0x32c   : > { %v823_v62 = vsub.f32 %v712_v41, %v815_v61  ;;  %v1386_v61 = vld [vmem:[%s2314_s8] ss:$0 sm:$0xff] }
 0x32e   : > { %v828_v63 = vmul.f32 1.442695, %v823_v62 }
 0x32f   : > { %v948_v1 = vpop.permute.xlu1 %947  ;;  %v818_v2 = vpop.xlane.xlu0 %817 }
 0x330   : > { %1619 = vpow2.f32 %v828_v63  ;;  %v953_v3 = vsel %vm855_vm3, %v948_v1, 0  ;;  %v824_v4 = vsub.f32 %v758_v45, %v818_v2 }
 0x331   : > { %1479 = vmatpush3.bf16.msra.mxu0 %v953_v3 }
 0x332   : > { %v830_v5 = vmul.f32 1.442695, %v824_v4  ;;  %1490 = vmatprep.subr.bf16.mxu0 %v1883_v0 }
 0x333   : > { %v821_v6 = vpop.xlane.xlu0 %820  ;;  %v996_v12 = vpop.permute.xlu1 %995 }
 0x334   : > { %1621 = vpow2.f32 %v830_v5  ;;  %v825_v7 = vsub.f32 %v804_v50, %v821_v6  ;;  %v1001_v15 = vsel %vm855_vm3, %v996_v12, 0  ;;  %v1390_v5 = vld [vmem:[%s2315_s9] ss:$0 sm:$0xff] }
 0x336   : > { %v832_v8 = vmul.f32 1.442695, %v825_v7 }
 0x337   : > { %v900_v9 = vpop.permute.xlu0 %899 }
 0x338   : > { %1623 = vpow2.f32 %v832_v8  ;;  %v905_v10 = vsel %vm855_vm3, %v900_v9, 0 }
 0x339   : > { %1473 = vmatpush3.bf16.msra.mxu1 %v905_v10 }
 0x33a   : > { %1484 = vmatprep.subr.bf16.mxu1 %v1883_v0 }
 0x33d   : > { %v1620_v11 = vpop.eup %1619 }
 0x33e   : > { %v837_v13 = vsel %vm625_vm2, %v1620_v11, 0.0  ;;  %v847_v14 = vpack.c.bf16 %v1620_v11, %v1620_v11 }
 0x33f   : > { %838 = vadd.xlane.f32.xlu0 %v837_v13 }
 0x340   : > { %1475 = vmatmul.mubr.msk.bf16.vlgmr.msra.gmra.mxu1 %vm625_vm2, %v847_v14 }
 0x341   : > { %v1622_v16 = vpop.eup %1621  ;;  %1485 = vmatpush3.bf16.msra.mxu1 %v1001_v15  ;;  %1486 = vmatprep.mubr.msk.bf16.mxu1 %vm1884_vm0, %v1883_v0 }
 0x342   : > { %v840_v17 = vsel %vm625_vm2, %v1622_v16, 0.0  ;;  %v848_v18 = vpack.c.bf16 %v1622_v16, %v1622_v16  ;;  %1498 = vmatprep.subr.bf16.mxu1 %v1883_v0 }
 0x343   : > { %841 = vadd.xlane.f32.xlu1 %v840_v17 }
 0x344   : > { %1481 = vmatmul.mubr.msk.bf16.vlgmr.msra.gmra.mxu0 %vm625_vm2, %v848_v18 }
 0x345   : > { %v1624_v19 = vpop.eup %1623  ;;  %1494 = vmatprep.mubr.msk.bf16.mxu0 %vm1884_vm0, %v1883_v0  ;;  %1491 = vmatpush3.bf16.msra.mxu0 %v1613_v30 }
 0x346   : > { %v843_v20 = vsel %vm625_vm2, %v1624_v19, 0.0  ;;  %v849_v21 = vpack.c.bf16 %v1624_v19, %v1624_v19  ;;  %1492 = vmatprep.subr.bf16.mxu0 %v1883_v0 }
 0x347   : > { %844 = vadd.xlane.f32.xlu0 %v843_v20 }
 0x348   : > { %1487 = vmatmul.mubr.msk.bf16.vlgmr.msra.gmra.mxu1 %vm625_vm2, %v849_v21 }
 0x349   : > { %1502 = vmatprep.mubr.msk.bf16.mxu1 %vm1884_vm0, %v1883_v0  ;;  %1493 = vmatpush3.bf16.msra.mxu0 %v1614_v31 }
 0x34a   : > { %1499 = vmatpush3.bf16.msra.mxu1 %v1615_v35 }
 0x34b   : > { %835 = vadd.xlane.f32.xlu0 %v834_v22  ;;  %1500 = vmatprep.subr.bf16.mxu1 %v1883_v0 }
 0x34e   : > { %1501 = vmatpush3.bf16.msra.mxu1 %v1616_v60 }
 0x38d   : > { %v893_v23 = vpop.f32.mrf.mxu0 }
 0x38f   : > { %v1470_v24 = vpop.f32.mrf.mxu0 }
 0x391   : > { %v896_v25 = vpop.f32.mrf.mxu0 }
 0x393   : > { %v1471_v26 = vpop.f32.mrf.mxu0 }
 0x3c8   : > { %v839_v27 = vpop.xlane.xlu0 %838 }
 0x3c9   : > { %1625 = vrcp.f32 %v839_v27 }
 0x3cc   : > { %v842_v28 = vpop.xlane.xlu1 %841 }
 0x3cd   : > { %1627 = vrcp.f32 %v842_v28 }
 0x3d0   : > { %v845_v29 = vpop.xlane.xlu0 %844 }
 0x3d1   : > { %1629 = vrcp.f32 %v845_v29 }
 0x3d4   : > { %v836_v51 = vpop.xlane.xlu0 %835 }
 0x3d5   : > { %1631 = vrcp.f32 %v836_v51 }
 0x3d6   : > { %v1626_v32 = vpop.eup %1625 }
 0x3da   : > { %v1628_v37 = vpop.eup %1627 }
 0x3de   : > { %v1630_v43 = vpop.eup %1629 }
 0x3e2   : > { %v1632_v52 = vpop.eup %1631 }
 0x3e3   : > { %v1047_v0 = vmul.f32 %v1632_v52, %v893_v23 }
 0x400   : > { %v941_v33 = vpop.f32.mrf.mxu1 }
 0x401   : > { %v1048_v34 = vmul.f32 %v1626_v32, %v941_v33 }
 0x402   : > { %v1476_v36 = vpop.f32.mrf.mxu1 }
 0x403   : > { %1052 = vrot.lane.b32.xlu1 %v1048_v34, %s1889_s26  ;;  %s1799_s26 = scalar_lea.vmem %s1798_s5, 128 }
 0x404   : > { %v944_v38 = vpop.f32.mrf.mxu1  ;;  %v989_v39 = vpop.f32.mrf.mxu0  ;;  %p1801_p4 = scmp.lt.s32.totalorder %s1799_s26, %s1793_s21 }
 0x405   : > { %v1049_v40 = vmul.f32 %v1628_v37, %v989_v39 }
 0x406   : > { %v1477_v41 = vpop.f32.mrf.mxu1  ;;  %v1482_v42 = vpop.f32.mrf.mxu0  ;;  %p1802_p6 = por %p1801_p4, %p1800_p1 }
 0x407   : > { %1056 = vrot.lane.b32.xlu0 %v1049_v40, %s1890_s12 }
 0x408   : > { %v992_v44 = vpop.f32.mrf.mxu0  ;;  %v1037_v45 = vpop.f32.mrf.mxu1  ;;  %p1803_p10 = pnand %p1802_p6, %p1796_p13 }
 0x409   : > { %v1050_v46 = vmul.f32 %v1630_v43, %v1037_v45 }
 0x40a   : > { %v1483_v47 = vpop.f32.mrf.mxu0  ;;  %v1488_v48 = vpop.f32.mrf.mxu1 }
 0x40b   : > { %1060 = vrot.lane.b32.xlu1 %v1050_v46, %s1891_s17 }
 0x40c   : > { %v1040_v49 = vpop.f32.mrf.mxu1 }
 0x40e   : > { %v1489_v50 = vpop.f32.mrf.mxu1 }
 0x475   : > { %v1053_v53 = vpop.permute.xlu1 %1052 }
 0x476   : > { %v1063_v55 = vsel %vm625_vm2, %v1047_v0, %v1053_v53 }
 0x479   : > { %v1057_v54 = vpop.permute.xlu0 %1056 }
 0x47a   : > { %v1065_v56 = vsel %vm1064_vm4, %v1063_v55, %v1057_v54 }
 0x47d   : > { %v1061_v57 = vpop.permute.xlu1 %1060 }
 0x47e   : > { %v1067_v58 = vsel %vm1066_vm5, %v1065_v56, %v1061_v57 }
 0x47f   : > { %v1068_v59 = vpack.c.bf16 %v1067_v58, %v1067_v58 }
 0x481   : > { %1495 = vmatmul.mubr.msk.bf16.vlgmr.msra.gmra.mxu0 %vm498_vm1, %v1068_v59 }
 0x541   : > { %v1129_v62 = vpop.f32.mrf.mxu0 }
 0x542   : > { %v1130_v63 = vadd.f32 %v1386_v61, %v1129_v62 }
 0x543   : > { %v1496_v1 = vpop.f32.mrf.mxu0 }
 0x544   : > { %v1135_v2 = vpack.c.bf16 %v1130_v63, %v1130_v63 }
 0x545   : > { %v1132_v3 = vpop.f32.mrf.mxu0 }
 0x546   : > { %1503 = vmatmul.mubr.msk.bf16.vlgmr.msra.gmra.mxu1 %vm498_vm1, %v1135_v2 }
 0x547   : > { %v1497_v4 = vpop.f32.mrf.mxu0 }
 0x606   : > { %v1196_v6 = vpop.f32.mrf.mxu1 }
 0x607   : > { %v1197_v7 = vadd.f32 %v1390_v5, %v1196_v6 }
 0x608   : > { %v1504_v8 = vpop.f32.mrf.mxu1 }
 0x609   : > { %v1202_v9 = vmax.f32 %v1197_v7, 0.0 }
 0x60a   : > { %v1199_v10 = vpop.f32.mrf.mxu1 }
 0x60b   : > { %v1203_v11 = vpack.c.bf16 %v1202_v9, %v1202_v9 }
 0x60c   : > { %v1505_v12 = vpop.f32.mrf.mxu1 }
 0x60d   : > { %1205 = vst.msk [vmem:[%s469_s27] sm:$0xf] %vm1204_vm6, %v1203_v11 }
 0x60e   : > { %1806 = shalt.err (!%p1803_p10)
}
 0x60f   : > { %s1807_s12 = scalar_lea.hbm %s2269_s28, 64  ;;  %s1811_s15 = scalar_lea.hbm %s2316_s10, 128 }
 0x610   : > { %p1808_p3 = scmp.ne.s32.totalorder %s2269_s28, %s1807_s12  ;;  %p1812_p8 = scmp.lt.s32.totalorder %s2269_s28, %s2316_s10 }
 0x611   : > { %p1813_p12 = scmp.lt.s32.totalorder %s1811_s15, %s1807_s12 }
 0x612   : > { %p1809_p7 = pnand %p1808_p3, %p2350_p9 }
 0x613   : > { %p1814_p0 = por %p1813_p12, %p1812_p8 }
 0x614   : > { %p1810_p5 = pneg %p1809_p7 }
 0x616   : > { %p1815_p2 = pnand %p1814_p0, %p1810_p5 }
 0x618   : > { %1818 = shalt.err (!%p1815_p2)
}
 0x619   : > { %1526 = dma.vmem_to_hbm [thread:$0]  (%p2350_p9), %s1221_s11, 64, %s2269_s28, %s1207_s29  }
 0x61a PF: > { %s1232_s2 = sand.u32 1, %s1861_s13   ;;  %p2351_p11 = scmp.ne.s32.totalorder %s2340_s24, 0 }
 0x61b   : > { %p2352_p13 = scmp.ge.s32.totalorder %s1873_s16, 2  ;;  %s1233_s25 = scalar_lea.sflag [#allocation4], %s1232_s2 }
 0x61d   : > { %p1549_p1 = pnand %p2352_p13, %p2351_p11 }
 0x61f   : > { %p1550_p4 = pneg %p1549_p1 }
 0x621   : > { %1856 = dma.done.wait (%p1550_p4), %s1233_s25, 64  }
 0x622   : > { %1858 = vsyncadd (%p1550_p4), %s1233_s25, 4294967232  ;;  %s2353_s16 = sld [smem:[#allocation21_spill]]  ;;  %s2356_s13 = smov %s1865_s14 }
 0x623   : > { %s2354_s20 = sld [smem:[#allocation20_spill]] }
 0x624   : > { %s2355_s15 = sld [smem:[#allocation22_spill]] }
 0x628   : > { %p28_p6 = scmp.ge.s32.totalorder %s2353_s16, 4  }
 0x629   : > { %s2357_s14 = smov %s2354_s20 }
 0x62a   :  { %30 = sbr.rel (!%p28_p6) target bundleno = 14 (0xe), region = 134 }
 0x62f   :  { %1238 = vsyncpa [#allocation3], 1 }
 0x630   :  { %1240 = vsyncpa [#allocation3 + $0x1], 1 }
 0x631   :  { %1241 = vsyncpa [#allocation6], 1 }
 0x632   :  { %1243 = vsyncpa [#allocation6 + $0x1], 1 }
 0x633   :  { %1244 = vsyncpa [#allocation9], 1 }
 0x634   :  { %1245 = vsyncpa [#allocation12], 1 }
 0x635   :  { %1246 = vsyncpa [#allocation4], 1 }
 0x636   :  { %1248 = vsyncpa [#allocation4 + $0x1], 1 }

</bundles_post_ra>
